<compile_context>
chip_gen: v6e
topology: v6e:2x2x1
jax: 0.10.0
libtpu: 0.0.40
codegen_flags: <defaults>
</compile_context>

<pallas_src>
import jax
import jax.numpy as jnp
from jax import lax
from jax.experimental import pallas as pl
from jax.experimental.pallas import tpu as pltpu

LN_EPS = 1e-12


def _pick_tile(seq_len):
    """Largest tile of tokens (multiple of 8, <= 512) that divides seq_len."""
    for ts in (512, 256, 128, 64, 32, 16, 8):
        if seq_len % ts == 0:
            return ts
    return 8  # unreachable: seq_len is padded to a multiple of 8 by the wrapper


def _embed_ln_kernel(ids_ref,    # SMEM (B, S_pad) int32   -- scalar prefetch
                     word_hbm,   # (V, H) f32, stays in HBM (memory_space=pl.ANY)
                     pos_ref,    # (TS, H) f32, VMEM tile of the position table
                     tt_ref,     # (1, TS, 1) f32 token-type ids (0./1.), VMEM
                     tok_ref,    # (2, H) f32 token-type table, resident in VMEM
                     gb_ref,     # (2, H) f32 [gamma; beta], resident in VMEM
                     o_ref,      # (1, TS, H) f32 output tile
                     wbuf,       # (2, TS, H) VMEM double-buffered gather scratch
                     sems):      # (2,) DMA semaphores, one per buffer slot
    s = pl.program_id(0)
    b = pl.program_id(1)
    num_s = pl.num_programs(0)
    num_b = pl.num_programs(1)
    _, TS, H = wbuf.shape

    t = s * num_b + b          # linear grid step (grid iterates sequentially)
    slot = t % 2
    nslot = 1 - slot

    def issue_gather(batch_idx, seq_idx, slot_idx):
        """Issue TS parallel row DMAs word_hbm[id] -> wbuf[slot_idx, r]."""
        base = pl.multiple_of(seq_idx * TS, TS)

        def _issue(r, carry):
            tok_id = ids_ref[batch_idx, base + r]
            pltpu.make_async_copy(
                word_hbm.at[pl.ds(tok_id, 1), :],
                wbuf.at[slot_idx, pl.ds(r, 1), :],
                sems.at[slot_idx]).start()
            return carry

        lax.fori_loop(0, TS, _issue, 0, unroll=8)

    # --- 0) Prime the pipeline: the very first grid step gathers its own rows.
    @pl.when(t == 0)
    def _():
        issue_gather(b, s, slot)

    # --- 1) One aggregate wait for all TS row DMAs of this tile (the wait
    #        descriptor covers the full (TS, H) slot == the summed row bytes).
    pltpu.make_async_copy(word_hbm.at[pl.ds(0, TS), :],
                          wbuf.at[slot],
                          sems.at[slot]).wait()

    # --- 2) Prefetch the next grid step's word rows into the other slot so the
    #        gather overlaps this step's LayerNorm + output writeback.
    is_last = jnp.logical_and(s == num_s - 1, b == num_b - 1)

    @pl.when(jnp.logical_not(is_last))
    def _():
        b_next = b + 1
        wrap = b_next == num_b
        issue_gather(jnp.where(wrap, 0, b_next),
                     jnp.where(wrap, s + 1, s),
                     nslot)

    # --- 3) word + position + token_type (FMA against the resident 2-row table).
    tok = tok_ref[...].astype(jnp.float32)                       # (2, H)
    tt = tt_ref[0]                                               # (TS, 1) in {0., 1.}
    tok_sel = tok[0:1, :] + tt * (tok[1:2, :] - tok[0:1, :])     # (TS, H)
    x = (wbuf[slot].astype(jnp.float32)
         + pos_ref[...].astype(jnp.float32)
         + tok_sel)

    # --- 4) LayerNorm over H: single-pass stats (biased variance, eps=1e-12).
    inv_h = 1.0 / H
    sum_x = jnp.sum(x, axis=-1, keepdims=True)
    sum_x2 = jnp.sum(x * x, axis=-1, keepdims=True)
    mean = sum_x * inv_h
    var = sum_x2 * inv_h - mean * mean
    inv = lax.rsqrt(var + LN_EPS)
    gb = gb_ref[...].astype(jnp.float32)                         # (2, H)
    y = (x - mean) * (inv * gb[0:1, :]) + gb[1:2, :]

    o_ref[0] = y.astype(o_ref.dtype)


def bert_embeddings_pallas(input_ids, token_type_ids, params):
    """input_ids, token_type_ids: (B, S) int. Returns (B, S, H) float32."""
    B, S = input_ids.shape
    if token_type_ids is None:
        token_type_ids = jnp.zeros_like(input_ids)

    word_emb = params["word_embeddings"]          # (V, H)
    pos_emb = params["position_embeddings"]       # (P, H)
    tok_emb = params["token_type_embeddings"]     # (2, H)
    gb = jnp.stack([params["ln_weight"], params["ln_bias"]], axis=0)  # (2, H)
    V, H = word_emb.shape

    # Pad S to a multiple of 8 so every (TS, H) block satisfies (8, 128) tiling.
    S_pad = ((S + 7) // 8) * 8
    ids = input_ids.astype(jnp.int32)
    tt = token_type_ids.astype(jnp.int32)
    if S_pad != S:
        ids = jnp.pad(ids, ((0, 0), (0, S_pad - S)))   # pad ids -> row 0 (harmless)
        tt = jnp.pad(tt, ((0, 0), (0, S_pad - S)))
    if pos_emb.shape[0] < S_pad:
        pos_emb = jnp.pad(pos_emb, ((0, S_pad - pos_emb.shape[0]), (0, 0)))
    assert pos_emb.shape[0] >= S_pad

    TS = _pick_tile(S_pad)
    num_s = S_pad // TS
    # Aggregate-wait descriptor slices TS rows of the word table (size-only use).
    assert V >= TS, "vocab_size must be >= token tile size"

    tt_f32 = tt.astype(jnp.float32).reshape(B, S_pad, 1)           # (B, S_pad, 1)

    word_spec = pl.BlockSpec(memory_space=pl.ANY)                  # raw HBM ref
    pos_spec = pl.BlockSpec((TS, H), lambda s, b, ids: (s, 0))     # constant over b
    tt_spec = pl.BlockSpec((1, TS, 1), lambda s, b, ids: (b, s, 0))
    tok_spec = pl.BlockSpec((2, H), lambda s, b, ids: (0, 0))      # resident
    gb_spec = pl.BlockSpec((2, H), lambda s, b, ids: (0, 0))       # resident
    out_spec = pl.BlockSpec((1, TS, H), lambda s, b, ids: (b, s, 0))

    elt = word_emb.dtype.itemsize
    vmem_needed = (2 * TS * H * elt        # double-buffered gather scratch
                   + 2 * TS * H * 4        # pos tile (pipeline double buffer)
                   + 2 * TS * H * 4        # output tile (pipeline double buffer)
                   + 2 * TS * 128 * 4      # tt tile (lane-padded)
                   + 4 * H * 4             # tok + gamma/beta
                   + (2 << 20))            # headroom
    vmem_limit = int(min(max(vmem_needed, 16 << 20), 48 << 20))

    grid_spec = pltpu.PrefetchScalarGridSpec(
        num_scalar_prefetch=1,
        grid=(num_s, B),                   # batch innermost -> pos tile reused
        in_specs=[word_spec, pos_spec, tt_spec, tok_spec, gb_spec],
        out_specs=out_spec,
        scratch_shapes=[
            pltpu.VMEM((2, TS, H), word_emb.dtype),   # gathered word rows (x2)
            pltpu.SemaphoreType.DMA((2,)),            # one sem per buffer slot
        ],
    )

    out = pl.pallas_call(
        _embed_ln_kernel,
        out_shape=jax.ShapeDtypeStruct((B, S_pad, H), jnp.float32),
        grid_spec=grid_spec,
        compiler_params=pltpu.CompilerParams(
            # Cross-step prefetch state requires sequential grid execution.
            # TODO(synk): v7x megacore sharding would need per-core priming.
            dimension_semantics=("arbitrary", "arbitrary"),
            vmem_limit_bytes=vmem_limit),
    )(ids, word_emb, pos_emb, tt_f32, tok_emb, gb)

    if S_pad != S:
        out = out[:, :S, :]
    return out


def init_params(key, vocab_size, hidden_size, max_position_embeddings):
    k1, k2, k3 = jax.random.split(key, 3)
    word = jax.random.normal(k1, (vocab_size, hidden_size), jnp.float32) * 0.02
    # padding_idx=0: nn.Embedding zeroes that row at init.
    word = word.at[0].set(0.0)
    pos = jax.random.normal(k2, (max_position_embeddings, hidden_size), jnp.float32) * 0.02
    tok = jax.random.normal(k3, (2, hidden_size), jnp.float32) * 0.02
    return {
        "word_embeddings": word,
        "position_embeddings": pos,
        "token_type_embeddings": tok,
        # torch nn.LayerNorm default init: weight=1, bias=0
        "ln_weight": jnp.ones((hidden_size,), jnp.float32),
        "ln_bias": jnp.zeros((hidden_size,), jnp.float32),
    }


def bert_embeddings_ref(input_ids, token_type_ids, params):
    """Pure-JAX reference (matches the PyTorch forward in eval mode)."""
    B, S = input_ids.shape
    pos_ids = jnp.broadcast_to(jnp.arange(S, dtype=jnp.int32)[None, :], (B, S))
    x = (params["word_embeddings"][input_ids]
         + params["position_embeddings"][pos_ids]
         + params["token_type_embeddings"][token_type_ids])
    mean = jnp.mean(x, axis=-1, keepdims=True)
    var = jnp.mean((x - mean) ** 2, axis=-1, keepdims=True)
    y = (x - mean) * lax.rsqrt(var + LN_EPS)
    return y * params["ln_weight"] + params["ln_bias"]


if __name__ == "__main__":
    # Small, BERT-embedding-consistent shapes.
    vocab_size = 64
    hidden_size = 128
    max_position_embeddings = 16
    B, S = 2, 8

    key = jax.random.PRNGKey(0)
    kp, ki, kt = jax.random.split(key, 3)

    params = init_params(kp, vocab_size, hidden_size, max_position_embeddings)
    input_ids = jax.random.randint(ki, (B, S), 0, vocab_size, dtype=jnp.int32)
    token_type_ids = jax.random.randint(kt, (B, S), 0, 2, dtype=jnp.int32)

    out = bert_embeddings_pallas(input_ids, token_type_ids, params)
    out = jax.block_until_ready(out)

    ref = bert_embeddings_ref(input_ids, token_type_ids, params)
    assert out.shape == (B, S, hidden_size)
    assert jnp.allclose(out, ref, atol=1e-5, rtol=1e-5), "mismatch vs reference"

    print("KERNEL_OK")
</pallas_src>

<mosaic_0001>
module attributes {stable_mosaic.version = 11 : i64} {
  func.func @_embed_ln_kernel(%arg0: i32, %arg1: i32, %arg2: memref<2x8xi32, #tpu.memory_space<smem>>, %arg3: memref<64x128xf32, #tpu.memory_space<any>>, %arg4: memref<8x128xf32, #tpu.memory_space<vmem>>, %arg5: memref<1x8x1xf32, #tpu.memory_space<vmem>>, %arg6: memref<2x128xf32, #tpu.memory_space<vmem>>, %arg7: memref<2x128xf32, #tpu.memory_space<vmem>>, %arg8: memref<1x8x128xf32, #tpu.memory_space<vmem>>, %arg9: memref<2x8x128xf32, #tpu.memory_space<vmem>>, %arg10: memref<2x!tpu.dma_semaphore, #tpu.memory_space<semaphore_mem>>) attributes {dimension_semantics = [#tpu.dimension_semantics<arbitrary>, #tpu.dimension_semantics<arbitrary>], iteration_bounds = array<i64: 1, 2>, scalar_prefetch = 1 : i64, scratch_operands = 2 : i64, tpu.core_type = #tpu.core_type<tc>, window_params = [{}, {transform_indices = @transform_1, window_bounds = array<i64: 8, 128>}, {transform_indices = @transform_2, window_bounds = array<i64: 1, 8, 1>}, {pipeline_mode = #tpu.pipeline_mode<synchronous>, transform_indices = @transform_3, window_bounds = array<i64: 2, 128>}, {pipeline_mode = #tpu.pipeline_mode<synchronous>, transform_indices = @transform_4, window_bounds = array<i64: 2, 128>}, {transform_indices = @transform_5, window_bounds = array<i64: 1, 8, 128>}]} {
    %c2_i32 = arith.constant 2 : i32
    %0 = arith.muli %arg0, %c2_i32 : i32
    %1 = arith.addi %0, %arg1 : i32
    %c2_i32_0 = arith.constant 2 : i32
    %c0_i32 = arith.constant 0 : i32
    %2 = arith.cmpi eq, %c2_i32_0, %c0_i32 : i32
    %c1_i32 = arith.constant 1 : i32
    %3 = arith.select %2, %c1_i32, %c2_i32_0 : i32
    %4 = arith.remsi %1, %3 : i32
    %c0_i32_1 = arith.constant 0 : i32
    %5 = arith.cmpi ne, %4, %c0_i32_1 : i32
    %c0_i32_2 = arith.constant 0 : i32
    %6 = arith.cmpi slt, %4, %c0_i32_2 : i32
    %c0_i32_3 = arith.constant 0 : i32
    %7 = arith.cmpi slt, %3, %c0_i32_3 : i32
    %8 = arith.xori %6, %7 : i1
    %9 = arith.andi %8, %5 : i1
    %10 = arith.addi %4, %3 : i32
    %11 = arith.select %9, %10, %4 : i32
    %c1_i32_4 = arith.constant 1 : i32
    %12 = arith.subi %c1_i32_4, %11 : i32
    %c0_i32_5 = arith.constant 0 : i32
    %13 = arith.cmpi eq, %1, %c0_i32_5 : i32
    %14 = arith.extui %13 : i1 to i32
    %c0_i32_6 = arith.constant 0 : i32
    %15 = arith.cmpi ne, %14, %c0_i32_6 : i32
    scf.if %15 {
      %c8_i32 = arith.constant 8 : i32
      %73 = arith.muli %arg0, %c8_i32 : i32
      %74 = tpu.assume_multiple %73, 8 : i32
      %c0_i32_31 = arith.constant 0 : i32
      %75 = arith.addi %74, %c0_i32_31 : i32
      %76 = arith.index_cast %arg1 : i32 to index
      %77 = arith.index_cast %75 : i32 to index
      %78 = memref.load %arg2[%76, %77] : memref<2x8xi32, #tpu.memory_space<smem>>
      %c0_i32_32 = arith.constant 0 : i32
      %79 = tpu.memref_slice %arg3[%78, %c0_i32_32] : memref<64x128xf32, #tpu.memory_space<any>> -> memref<1x128xf32, #tpu.memory_space<any>>
      %c0_i32_33 = arith.constant 0 : i32
      %80 = tpu.memref_slice %arg9[%11, %c0_i32_31, %c0_i32_33] : memref<2x8x128xf32, #tpu.memory_space<vmem>> -> memref<1x1x128xf32, #tpu.memory_space<vmem>>
      %81 = tpu.memref_squeeze %80 : memref<1x1x128xf32, #tpu.memory_space<vmem>> -> memref<1x128xf32, #tpu.memory_space<vmem>>
      %82 = tpu.memref_slice %arg10[%11] : memref<2x!tpu.dma_semaphore, #tpu.memory_space<semaphore_mem>> -> memref<1x!tpu.dma_semaphore, #tpu.memory_space<semaphore_mem>>
      %83 = tpu.memref_squeeze %82 : memref<1x!tpu.dma_semaphore, #tpu.memory_space<semaphore_mem>> -> memref<!tpu.dma_semaphore, #tpu.memory_space<semaphore_mem>>
      tpu.enqueue_dma source(%79 : memref<1x128xf32, #tpu.memory_space<any>>) target(%81 : memref<1x128xf32, #tpu.memory_space<vmem>>) target_semaphore(%83 : memref<!tpu.dma_semaphore, #tpu.memory_space<semaphore_mem>>)
      %c1_i32_34 = arith.constant 1 : i32
      %84 = arith.addi %74, %c1_i32_34 : i32
      %85 = arith.index_cast %arg1 : i32 to index
      %86 = arith.index_cast %84 : i32 to index
      %87 = memref.load %arg2[%85, %86] : memref<2x8xi32, #tpu.memory_space<smem>>
      %c0_i32_35 = arith.constant 0 : i32
      %88 = tpu.memref_slice %arg3[%87, %c0_i32_35] : memref<64x128xf32, #tpu.memory_space<any>> -> memref<1x128xf32, #tpu.memory_space<any>>
      %c0_i32_36 = arith.constant 0 : i32
      %89 = tpu.memref_slice %arg9[%11, %c1_i32_34, %c0_i32_36] : memref<2x8x128xf32, #tpu.memory_space<vmem>> -> memref<1x1x128xf32, #tpu.memory_space<vmem>>
      %90 = tpu.memref_squeeze %89 : memref<1x1x128xf32, #tpu.memory_space<vmem>> -> memref<1x128xf32, #tpu.memory_space<vmem>>
      %91 = tpu.memref_slice %arg10[%11] : memref<2x!tpu.dma_semaphore, #tpu.memory_space<semaphore_mem>> -> memref<1x!tpu.dma_semaphore, #tpu.memory_space<semaphore_mem>>
      %92 = tpu.memref_squeeze %91 : memref<1x!tpu.dma_semaphore, #tpu.memory_space<semaphore_mem>> -> memref<!tpu.dma_semaphore, #tpu.memory_space<semaphore_mem>>
      tpu.enqueue_dma source(%88 : memref<1x128xf32, #tpu.memory_space<any>>) target(%90 : memref<1x128xf32, #tpu.memory_space<vmem>>) target_semaphore(%92 : memref<!tpu.dma_semaphore, #tpu.memory_space<semaphore_mem>>)
      %c2_i32_37 = arith.constant 2 : i32
      %93 = arith.addi %74, %c2_i32_37 : i32
      %94 = arith.index_cast %arg1 : i32 to index
      %95 = arith.index_cast %93 : i32 to index
      %96 = memref.load %arg2[%94, %95] : memref<2x8xi32, #tpu.memory_space<smem>>
      %c0_i32_38 = arith.constant 0 : i32
      %97 = tpu.memref_slice %arg3[%96, %c0_i32_38] : memref<64x128xf32, #tpu.memory_space<any>> -> memref<1x128xf32, #tpu.memory_space<any>>
      %c0_i32_39 = arith.constant 0 : i32
      %98 = tpu.memref_slice %arg9[%11, %c2_i32_37, %c0_i32_39] : memref<2x8x128xf32, #tpu.memory_space<vmem>> -> memref<1x1x128xf32, #tpu.memory_space<vmem>>
      %99 = tpu.memref_squeeze %98 : memref<1x1x128xf32, #tpu.memory_space<vmem>> -> memref<1x128xf32, #tpu.memory_space<vmem>>
      %100 = tpu.memref_slice %arg10[%11] : memref<2x!tpu.dma_semaphore, #tpu.memory_space<semaphore_mem>> -> memref<1x!tpu.dma_semaphore, #tpu.memory_space<semaphore_mem>>
      %101 = tpu.memref_squeeze %100 : memref<1x!tpu.dma_semaphore, #tpu.memory_space<semaphore_mem>> -> memref<!tpu.dma_semaphore, #tpu.memory_space<semaphore_mem>>
      tpu.enqueue_dma source(%97 : memref<1x128xf32, #tpu.memory_space<any>>) target(%99 : memref<1x128xf32, #tpu.memory_space<vmem>>) target_semaphore(%101 : memref<!tpu.dma_semaphore, #tpu.memory_space<semaphore_mem>>)
      %c3_i32 = arith.constant 3 : i32
      %102 = arith.addi %74, %c3_i32 : i32
      %103 = arith.index_cast %arg1 : i32 to index
      %104 = arith.index_cast %102 : i32 to index
      %105 = memref.load %arg2[%103, %104] : memref<2x8xi32, #tpu.memory_space<smem>>
      %c0_i32_40 = arith.constant 0 : i32
      %106 = tpu.memref_slice %arg3[%105, %c0_i32_40] : memref<64x128xf32, #tpu.memory_space<any>> -> memref<1x128xf32, #tpu.memory_space<any>>
      %c0_i32_41 = arith.constant 0 : i32
      %107 = tpu.memref_slice %arg9[%11, %c3_i32, %c0_i32_41] : memref<2x8x128xf32, #tpu.memory_space<vmem>> -> memref<1x1x128xf32, #tpu.memory_space<vmem>>
      %108 = tpu.memref_squeeze %107 : memref<1x1x128xf32, #tpu.memory_space<vmem>> -> memref<1x128xf32, #tpu.memory_space<vmem>>
      %109 = tpu.memref_slice %arg10[%11] : memref<2x!tpu.dma_semaphore, #tpu.memory_space<semaphore_mem>> -> memref<1x!tpu.dma_semaphore, #tpu.memory_space<semaphore_mem>>
      %110 = tpu.memref_squeeze %109 : memref<1x!tpu.dma_semaphore, #tpu.memory_space<semaphore_mem>> -> memref<!tpu.dma_semaphore, #tpu.memory_space<semaphore_mem>>
      tpu.enqueue_dma source(%106 : memref<1x128xf32, #tpu.memory_space<any>>) target(%108 : memref<1x128xf32, #tpu.memory_space<vmem>>) target_semaphore(%110 : memref<!tpu.dma_semaphore, #tpu.memory_space<semaphore_mem>>)
      %c4_i32 = arith.constant 4 : i32
      %111 = arith.addi %74, %c4_i32 : i32
      %112 = arith.index_cast %arg1 : i32 to index
      %113 = arith.index_cast %111 : i32 to index
      %114 = memref.load %arg2[%112, %113] : memref<2x8xi32, #tpu.memory_space<smem>>
      %c0_i32_42 = arith.constant 0 : i32
      %115 = tpu.memref_slice %arg3[%114, %c0_i32_42] : memref<64x128xf32, #tpu.memory_space<any>> -> memref<1x128xf32, #tpu.memory_space<any>>
      %c0_i32_43 = arith.constant 0 : i32
      %116 = tpu.memref_slice %arg9[%11, %c4_i32, %c0_i32_43] : memref<2x8x128xf32, #tpu.memory_space<vmem>> -> memref<1x1x128xf32, #tpu.memory_space<vmem>>
      %117 = tpu.memref_squeeze %116 : memref<1x1x128xf32, #tpu.memory_space<vmem>> -> memref<1x128xf32, #tpu.memory_space<vmem>>
      %118 = tpu.memref_slice %arg10[%11] : memref<2x!tpu.dma_semaphore, #tpu.memory_space<semaphore_mem>> -> memref<1x!tpu.dma_semaphore, #tpu.memory_space<semaphore_mem>>
      %119 = tpu.memref_squeeze %118 : memref<1x!tpu.dma_semaphore, #tpu.memory_space<semaphore_mem>> -> memref<!tpu.dma_semaphore, #tpu.memory_space<semaphore_mem>>
      tpu.enqueue_dma source(%115 : memref<1x128xf32, #tpu.memory_space<any>>) target(%117 : memref<1x128xf32, #tpu.memory_space<vmem>>) target_semaphore(%119 : memref<!tpu.dma_semaphore, #tpu.memory_space<semaphore_mem>>)
      %c5_i32 = arith.constant 5 : i32
      %120 = arith.addi %74, %c5_i32 : i32
      %121 = arith.index_cast %arg1 : i32 to index
      %122 = arith.index_cast %120 : i32 to index
      %123 = memref.load %arg2[%121, %122] : memref<2x8xi32, #tpu.memory_space<smem>>
      %c0_i32_44 = arith.constant 0 : i32
      %124 = tpu.memref_slice %arg3[%123, %c0_i32_44] : memref<64x128xf32, #tpu.memory_space<any>> -> memref<1x128xf32, #tpu.memory_space<any>>
      %c0_i32_45 = arith.constant 0 : i32
      %125 = tpu.memref_slice %arg9[%11, %c5_i32, %c0_i32_45] : memref<2x8x128xf32, #tpu.memory_space<vmem>> -> memref<1x1x128xf32, #tpu.memory_space<vmem>>
      %126 = tpu.memref_squeeze %125 : memref<1x1x128xf32, #tpu.memory_space<vmem>> -> memref<1x128xf32, #tpu.memory_space<vmem>>
      %127 = tpu.memref_slice %arg10[%11] : memref<2x!tpu.dma_semaphore, #tpu.memory_space<semaphore_mem>> -> memref<1x!tpu.dma_semaphore, #tpu.memory_space<semaphore_mem>>
      %128 = tpu.memref_squeeze %127 : memref<1x!tpu.dma_semaphore, #tpu.memory_space<semaphore_mem>> -> memref<!tpu.dma_semaphore, #tpu.memory_space<semaphore_mem>>
      tpu.enqueue_dma source(%124 : memref<1x128xf32, #tpu.memory_space<any>>) target(%126 : memref<1x128xf32, #tpu.memory_space<vmem>>) target_semaphore(%128 : memref<!tpu.dma_semaphore, #tpu.memory_space<semaphore_mem>>)
      %c6_i32 = arith.constant 6 : i32
      %129 = arith.addi %74, %c6_i32 : i32
      %130 = arith.index_cast %arg1 : i32 to index
      %131 = arith.index_cast %129 : i32 to index
      %132 = memref.load %arg2[%130, %131] : memref<2x8xi32, #tpu.memory_space<smem>>
      %c0_i32_46 = arith.constant 0 : i32
      %133 = tpu.memref_slice %arg3[%132, %c0_i32_46] : memref<64x128xf32, #tpu.memory_space<any>> -> memref<1x128xf32, #tpu.memory_space<any>>
      %c0_i32_47 = arith.constant 0 : i32
      %134 = tpu.memref_slice %arg9[%11, %c6_i32, %c0_i32_47] : memref<2x8x128xf32, #tpu.memory_space<vmem>> -> memref<1x1x128xf32, #tpu.memory_space<vmem>>
      %135 = tpu.memref_squeeze %134 : memref<1x1x128xf32, #tpu.memory_space<vmem>> -> memref<1x128xf32, #tpu.memory_space<vmem>>
      %136 = tpu.memref_slice %arg10[%11] : memref<2x!tpu.dma_semaphore, #tpu.memory_space<semaphore_mem>> -> memref<1x!tpu.dma_semaphore, #tpu.memory_space<semaphore_mem>>
      %137 = tpu.memref_squeeze %136 : memref<1x!tpu.dma_semaphore, #tpu.memory_space<semaphore_mem>> -> memref<!tpu.dma_semaphore, #tpu.memory_space<semaphore_mem>>
      tpu.enqueue_dma source(%133 : memref<1x128xf32, #tpu.memory_space<any>>) target(%135 : memref<1x128xf32, #tpu.memory_space<vmem>>) target_semaphore(%137 : memref<!tpu.dma_semaphore, #tpu.memory_space<semaphore_mem>>)
      %c7_i32 = arith.constant 7 : i32
      %138 = arith.addi %74, %c7_i32 : i32
      %139 = arith.index_cast %arg1 : i32 to index
      %140 = arith.index_cast %138 : i32 to index
      %141 = memref.load %arg2[%139, %140] : memref<2x8xi32, #tpu.memory_space<smem>>
      %c0_i32_48 = arith.constant 0 : i32
      %142 = tpu.memref_slice %arg3[%141, %c0_i32_48] : memref<64x128xf32, #tpu.memory_space<any>> -> memref<1x128xf32, #tpu.memory_space<any>>
      %c0_i32_49 = arith.constant 0 : i32
      %143 = tpu.memref_slice %arg9[%11, %c7_i32, %c0_i32_49] : memref<2x8x128xf32, #tpu.memory_space<vmem>> -> memref<1x1x128xf32, #tpu.memory_space<vmem>>
      %144 = tpu.memref_squeeze %143 : memref<1x1x128xf32, #tpu.memory_space<vmem>> -> memref<1x128xf32, #tpu.memory_space<vmem>>
      %145 = tpu.memref_slice %arg10[%11] : memref<2x!tpu.dma_semaphore, #tpu.memory_space<semaphore_mem>> -> memref<1x!tpu.dma_semaphore, #tpu.memory_space<semaphore_mem>>
      %146 = tpu.memref_squeeze %145 : memref<1x!tpu.dma_semaphore, #tpu.memory_space<semaphore_mem>> -> memref<!tpu.dma_semaphore, #tpu.memory_space<semaphore_mem>>
      tpu.enqueue_dma source(%142 : memref<1x128xf32, #tpu.memory_space<any>>) target(%144 : memref<1x128xf32, #tpu.memory_space<vmem>>) target_semaphore(%146 : memref<!tpu.dma_semaphore, #tpu.memory_space<semaphore_mem>>)
      %c8_i32_50 = arith.constant 8 : i32
    } else {
    }
    %c0_i32_7 = arith.constant 0 : i32
    %c0_i32_8 = arith.constant 0 : i32
    %16 = tpu.memref_slice %arg3[%c0_i32_7, %c0_i32_8] : memref<64x128xf32, #tpu.memory_space<any>> -> memref<8x128xf32, #tpu.memory_space<any>>
    %c0_i32_9 = arith.constant 0 : i32
    %c0_i32_10 = arith.constant 0 : i32
    %17 = tpu.memref_slice %arg9[%11, %c0_i32_9, %c0_i32_10] : memref<2x8x128xf32, #tpu.memory_space<vmem>> -> memref<1x8x128xf32, #tpu.memory_space<vmem>>
    %18 = tpu.memref_squeeze %17 : memref<1x8x128xf32, #tpu.memory_space<vmem>> -> memref<8x128xf32, #tpu.memory_space<vmem>>
    %19 = tpu.memref_slice %arg10[%11] : memref<2x!tpu.dma_semaphore, #tpu.memory_space<semaphore_mem>> -> memref<1x!tpu.dma_semaphore, #tpu.memory_space<semaphore_mem>>
    %20 = tpu.memref_squeeze %19 : memref<1x!tpu.dma_semaphore, #tpu.memory_space<semaphore_mem>> -> memref<!tpu.dma_semaphore, #tpu.memory_space<semaphore_mem>>
    tpu.wait_dma2 semaphore(%20 : memref<!tpu.dma_semaphore, #tpu.memory_space<semaphore_mem>>) src(%16 : memref<8x128xf32, #tpu.memory_space<any>>) dst(%18 : memref<8x128xf32, #tpu.memory_space<vmem>>)
    %c0_i32_11 = arith.constant 0 : i32
    %21 = arith.cmpi eq, %arg0, %c0_i32_11 : i32
    %c1_i32_12 = arith.constant 1 : i32
    %22 = arith.cmpi eq, %arg1, %c1_i32_12 : i32
    %23 = arith.andi %21, %22 : i1
    %true = arith.constant true
    %24 = arith.xori %23, %true : i1
    %25 = arith.extui %24 : i1 to i32
    %c0_i32_13 = arith.constant 0 : i32
    %26 = arith.cmpi ne, %25, %c0_i32_13 : i32
    scf.if %26 {
      %c1_i32_31 = arith.constant 1 : i32
      %73 = arith.addi %arg1, %c1_i32_31 : i32
      %c2_i32_32 = arith.constant 2 : i32
      %74 = arith.cmpi eq, %73, %c2_i32_32 : i32
      %c0_i32_33 = arith.constant 0 : i32
      %75 = arith.select %74, %c0_i32_33, %73 : i32
      %c1_i32_34 = arith.constant 1 : i32
      %76 = arith.addi %arg0, %c1_i32_34 : i32
      %77 = arith.select %74, %76, %arg0 : i32
      %c8_i32 = arith.constant 8 : i32
      %78 = arith.muli %77, %c8_i32 : i32
      %79 = tpu.assume_multiple %78, 8 : i32
      %c0_i32_35 = arith.constant 0 : i32
      %80 = arith.addi %79, %c0_i32_35 : i32
      %81 = arith.index_cast %75 : i32 to index
      %82 = arith.index_cast %80 : i32 to index
      %83 = memref.load %arg2[%81, %82] : memref<2x8xi32, #tpu.memory_space<smem>>
      %c0_i32_36 = arith.constant 0 : i32
      %84 = tpu.memref_slice %arg3[%83, %c0_i32_36] : memref<64x128xf32, #tpu.memory_space<any>> -> memref<1x128xf32, #tpu.memory_space<any>>
      %c0_i32_37 = arith.constant 0 : i32
      %85 = tpu.memref_slice %arg9[%12, %c0_i32_35, %c0_i32_37] : memref<2x8x128xf32, #tpu.memory_space<vmem>> -> memref<1x1x128xf32, #tpu.memory_space<vmem>>
      %86 = tpu.memref_squeeze %85 : memref<1x1x128xf32, #tpu.memory_space<vmem>> -> memref<1x128xf32, #tpu.memory_space<vmem>>
      %87 = tpu.memref_slice %arg10[%12] : memref<2x!tpu.dma_semaphore, #tpu.memory_space<semaphore_mem>> -> memref<1x!tpu.dma_semaphore, #tpu.memory_space<semaphore_mem>>
      %88 = tpu.memref_squeeze %87 : memref<1x!tpu.dma_semaphore, #tpu.memory_space<semaphore_mem>> -> memref<!tpu.dma_semaphore, #tpu.memory_space<semaphore_mem>>
      tpu.enqueue_dma source(%84 : memref<1x128xf32, #tpu.memory_space<any>>) target(%86 : memref<1x128xf32, #tpu.memory_space<vmem>>) target_semaphore(%88 : memref<!tpu.dma_semaphore, #tpu.memory_space<semaphore_mem>>)
      %c1_i32_38 = arith.constant 1 : i32
      %89 = arith.addi %79, %c1_i32_38 : i32
      %90 = arith.index_cast %75 : i32 to index
      %91 = arith.index_cast %89 : i32 to index
      %92 = memref.load %arg2[%90, %91] : memref<2x8xi32, #tpu.memory_space<smem>>
      %c0_i32_39 = arith.constant 0 : i32
      %93 = tpu.memref_slice %arg3[%92, %c0_i32_39] : memref<64x128xf32, #tpu.memory_space<any>> -> memref<1x128xf32, #tpu.memory_space<any>>
      %c0_i32_40 = arith.constant 0 : i32
      %94 = tpu.memref_slice %arg9[%12, %c1_i32_38, %c0_i32_40] : memref<2x8x128xf32, #tpu.memory_space<vmem>> -> memref<1x1x128xf32, #tpu.memory_space<vmem>>
      %95 = tpu.memref_squeeze %94 : memref<1x1x128xf32, #tpu.memory_space<vmem>> -> memref<1x128xf32, #tpu.memory_space<vmem>>
      %96 = tpu.memref_slice %arg10[%12] : memref<2x!tpu.dma_semaphore, #tpu.memory_space<semaphore_mem>> -> memref<1x!tpu.dma_semaphore, #tpu.memory_space<semaphore_mem>>
      %97 = tpu.memref_squeeze %96 : memref<1x!tpu.dma_semaphore, #tpu.memory_space<semaphore_mem>> -> memref<!tpu.dma_semaphore, #tpu.memory_space<semaphore_mem>>
      tpu.enqueue_dma source(%93 : memref<1x128xf32, #tpu.memory_space<any>>) target(%95 : memref<1x128xf32, #tpu.memory_space<vmem>>) target_semaphore(%97 : memref<!tpu.dma_semaphore, #tpu.memory_space<semaphore_mem>>)
      %c2_i32_41 = arith.constant 2 : i32
      %98 = arith.addi %79, %c2_i32_41 : i32
      %99 = arith.index_cast %75 : i32 to index
      %100 = arith.index_cast %98 : i32 to index
      %101 = memref.load %arg2[%99, %100] : memref<2x8xi32, #tpu.memory_space<smem>>
      %c0_i32_42 = arith.constant 0 : i32
      %102 = tpu.memref_slice %arg3[%101, %c0_i32_42] : memref<64x128xf32, #tpu.memory_space<any>> -> memref<1x128xf32, #tpu.memory_space<any>>
      %c0_i32_43 = arith.constant 0 : i32
      %103 = tpu.memref_slice %arg9[%12, %c2_i32_41, %c0_i32_43] : memref<2x8x128xf32, #tpu.memory_space<vmem>> -> memref<1x1x128xf32, #tpu.memory_space<vmem>>
      %104 = tpu.memref_squeeze %103 : memref<1x1x128xf32, #tpu.memory_space<vmem>> -> memref<1x128xf32, #tpu.memory_space<vmem>>
      %105 = tpu.memref_slice %arg10[%12] : memref<2x!tpu.dma_semaphore, #tpu.memory_space<semaphore_mem>> -> memref<1x!tpu.dma_semaphore, #tpu.memory_space<semaphore_mem>>
      %106 = tpu.memref_squeeze %105 : memref<1x!tpu.dma_semaphore, #tpu.memory_space<semaphore_mem>> -> memref<!tpu.dma_semaphore, #tpu.memory_space<semaphore_mem>>
      tpu.enqueue_dma source(%102 : memref<1x128xf32, #tpu.memory_space<any>>) target(%104 : memref<1x128xf32, #tpu.memory_space<vmem>>) target_semaphore(%106 : memref<!tpu.dma_semaphore, #tpu.memory_space<semaphore_mem>>)
      %c3_i32 = arith.constant 3 : i32
      %107 = arith.addi %79, %c3_i32 : i32
      %108 = arith.index_cast %75 : i32 to index
      %109 = arith.index_cast %107 : i32 to index
      %110 = memref.load %arg2[%108, %109] : memref<2x8xi32, #tpu.memory_space<smem>>
      %c0_i32_44 = arith.constant 0 : i32
      %111 = tpu.memref_slice %arg3[%110, %c0_i32_44] : memref<64x128xf32, #tpu.memory_space<any>> -> memref<1x128xf32, #tpu.memory_space<any>>
      %c0_i32_45 = arith.constant 0 : i32
      %112 = tpu.memref_slice %arg9[%12, %c3_i32, %c0_i32_45] : memref<2x8x128xf32, #tpu.memory_space<vmem>> -> memref<1x1x128xf32, #tpu.memory_space<vmem>>
      %113 = tpu.memref_squeeze %112 : memref<1x1x128xf32, #tpu.memory_space<vmem>> -> memref<1x128xf32, #tpu.memory_space<vmem>>
      %114 = tpu.memref_slice %arg10[%12] : memref<2x!tpu.dma_semaphore, #tpu.memory_space<semaphore_mem>> -> memref<1x!tpu.dma_semaphore, #tpu.memory_space<semaphore_mem>>
      %115 = tpu.memref_squeeze %114 : memref<1x!tpu.dma_semaphore, #tpu.memory_space<semaphore_mem>> -> memref<!tpu.dma_semaphore, #tpu.memory_space<semaphore_mem>>
      tpu.enqueue_dma source(%111 : memref<1x128xf32, #tpu.memory_space<any>>) target(%113 : memref<1x128xf32, #tpu.memory_space<vmem>>) target_semaphore(%115 : memref<!tpu.dma_semaphore, #tpu.memory_space<semaphore_mem>>)
      %c4_i32 = arith.constant 4 : i32
      %116 = arith.addi %79, %c4_i32 : i32
      %117 = arith.index_cast %75 : i32 to index
      %118 = arith.index_cast %116 : i32 to index
      %119 = memref.load %arg2[%117, %118] : memref<2x8xi32, #tpu.memory_space<smem>>
      %c0_i32_46 = arith.constant 0 : i32
      %120 = tpu.memref_slice %arg3[%119, %c0_i32_46] : memref<64x128xf32, #tpu.memory_space<any>> -> memref<1x128xf32, #tpu.memory_space<any>>
      %c0_i32_47 = arith.constant 0 : i32
      %121 = tpu.memref_slice %arg9[%12, %c4_i32, %c0_i32_47] : memref<2x8x128xf32, #tpu.memory_space<vmem>> -> memref<1x1x128xf32, #tpu.memory_space<vmem>>
      %122 = tpu.memref_squeeze %121 : memref<1x1x128xf32, #tpu.memory_space<vmem>> -> memref<1x128xf32, #tpu.memory_space<vmem>>
      %123 = tpu.memref_slice %arg10[%12] : memref<2x!tpu.dma_semaphore, #tpu.memory_space<semaphore_mem>> -> memref<1x!tpu.dma_semaphore, #tpu.memory_space<semaphore_mem>>
      %124 = tpu.memref_squeeze %123 : memref<1x!tpu.dma_semaphore, #tpu.memory_space<semaphore_mem>> -> memref<!tpu.dma_semaphore, #tpu.memory_space<semaphore_mem>>
      tpu.enqueue_dma source(%120 : memref<1x128xf32, #tpu.memory_space<any>>) target(%122 : memref<1x128xf32, #tpu.memory_space<vmem>>) target_semaphore(%124 : memref<!tpu.dma_semaphore, #tpu.memory_space<semaphore_mem>>)
      %c5_i32 = arith.constant 5 : i32
      %125 = arith.addi %79, %c5_i32 : i32
      %126 = arith.index_cast %75 : i32 to index
      %127 = arith.index_cast %125 : i32 to index
      %128 = memref.load %arg2[%126, %127] : memref<2x8xi32, #tpu.memory_space<smem>>
      %c0_i32_48 = arith.constant 0 : i32
      %129 = tpu.memref_slice %arg3[%128, %c0_i32_48] : memref<64x128xf32, #tpu.memory_space<any>> -> memref<1x128xf32, #tpu.memory_space<any>>
      %c0_i32_49 = arith.constant 0 : i32
      %130 = tpu.memref_slice %arg9[%12, %c5_i32, %c0_i32_49] : memref<2x8x128xf32, #tpu.memory_space<vmem>> -> memref<1x1x128xf32, #tpu.memory_space<vmem>>
      %131 = tpu.memref_squeeze %130 : memref<1x1x128xf32, #tpu.memory_space<vmem>> -> memref<1x128xf32, #tpu.memory_space<vmem>>
      %132 = tpu.memref_slice %arg10[%12] : memref<2x!tpu.dma_semaphore, #tpu.memory_space<semaphore_mem>> -> memref<1x!tpu.dma_semaphore, #tpu.memory_space<semaphore_mem>>
      %133 = tpu.memref_squeeze %132 : memref<1x!tpu.dma_semaphore, #tpu.memory_space<semaphore_mem>> -> memref<!tpu.dma_semaphore, #tpu.memory_space<semaphore_mem>>
      tpu.enqueue_dma source(%129 : memref<1x128xf32, #tpu.memory_space<any>>) target(%131 : memref<1x128xf32, #tpu.memory_space<vmem>>) target_semaphore(%133 : memref<!tpu.dma_semaphore, #tpu.memory_space<semaphore_mem>>)
      %c6_i32 = arith.constant 6 : i32
      %134 = arith.addi %79, %c6_i32 : i32
      %135 = arith.index_cast %75 : i32 to index
      %136 = arith.index_cast %134 : i32 to index
      %137 = memref.load %arg2[%135, %136] : memref<2x8xi32, #tpu.memory_space<smem>>
      %c0_i32_50 = arith.constant 0 : i32
      %138 = tpu.memref_slice %arg3[%137, %c0_i32_50] : memref<64x128xf32, #tpu.memory_space<any>> -> memref<1x128xf32, #tpu.memory_space<any>>
      %c0_i32_51 = arith.constant 0 : i32
      %139 = tpu.memref_slice %arg9[%12, %c6_i32, %c0_i32_51] : memref<2x8x128xf32, #tpu.memory_space<vmem>> -> memref<1x1x128xf32, #tpu.memory_space<vmem>>
      %140 = tpu.memref_squeeze %139 : memref<1x1x128xf32, #tpu.memory_space<vmem>> -> memref<1x128xf32, #tpu.memory_space<vmem>>
      %141 = tpu.memref_slice %arg10[%12] : memref<2x!tpu.dma_semaphore, #tpu.memory_space<semaphore_mem>> -> memref<1x!tpu.dma_semaphore, #tpu.memory_space<semaphore_mem>>
      %142 = tpu.memref_squeeze %141 : memref<1x!tpu.dma_semaphore, #tpu.memory_space<semaphore_mem>> -> memref<!tpu.dma_semaphore, #tpu.memory_space<semaphore_mem>>
      tpu.enqueue_dma source(%138 : memref<1x128xf32, #tpu.memory_space<any>>) target(%140 : memref<1x128xf32, #tpu.memory_space<vmem>>) target_semaphore(%142 : memref<!tpu.dma_semaphore, #tpu.memory_space<semaphore_mem>>)
      %c7_i32 = arith.constant 7 : i32
      %143 = arith.addi %79, %c7_i32 : i32
      %144 = arith.index_cast %75 : i32 to index
      %145 = arith.index_cast %143 : i32 to index
      %146 = memref.load %arg2[%144, %145] : memref<2x8xi32, #tpu.memory_space<smem>>
      %c0_i32_52 = arith.constant 0 : i32
      %147 = tpu.memref_slice %arg3[%146, %c0_i32_52] : memref<64x128xf32, #tpu.memory_space<any>> -> memref<1x128xf32, #tpu.memory_space<any>>
      %c0_i32_53 = arith.constant 0 : i32
      %148 = tpu.memref_slice %arg9[%12, %c7_i32, %c0_i32_53] : memref<2x8x128xf32, #tpu.memory_space<vmem>> -> memref<1x1x128xf32, #tpu.memory_space<vmem>>
      %149 = tpu.memref_squeeze %148 : memref<1x1x128xf32, #tpu.memory_space<vmem>> -> memref<1x128xf32, #tpu.memory_space<vmem>>
      %150 = tpu.memref_slice %arg10[%12] : memref<2x!tpu.dma_semaphore, #tpu.memory_space<semaphore_mem>> -> memref<1x!tpu.dma_semaphore, #tpu.memory_space<semaphore_mem>>
      %151 = tpu.memref_squeeze %150 : memref<1x!tpu.dma_semaphore, #tpu.memory_space<semaphore_mem>> -> memref<!tpu.dma_semaphore, #tpu.memory_space<semaphore_mem>>
      tpu.enqueue_dma source(%147 : memref<1x128xf32, #tpu.memory_space<any>>) target(%149 : memref<1x128xf32, #tpu.memory_space<vmem>>) target_semaphore(%151 : memref<!tpu.dma_semaphore, #tpu.memory_space<semaphore_mem>>)
      %c8_i32_54 = arith.constant 8 : i32
    } else {
    }
    %c0 = arith.constant 0 : index
    %c0_14 = arith.constant 0 : index
    %27 = vector.load %arg6[%c0, %c0_14] : memref<2x128xf32, #tpu.memory_space<vmem>>, vector<2x128xf32>
    %c0_15 = arith.constant 0 : index
    %c0_16 = arith.constant 0 : index
    %c0_17 = arith.constant 0 : index
    %28 = vector.load %arg5[%c0_15, %c0_16, %c0_17] : memref<1x8x1xf32, #tpu.memory_space<vmem>>, vector<1x8x1xf32>
    %29 = vector.shape_cast %28 : vector<1x8x1xf32> to vector<8x1xf32>
    %30 = vector.extract_strided_slice %27 {offsets = [0, 0], sizes = [1, 128], strides = [1, 1]} : vector<2x128xf32> to vector<1x128xf32>
    %31 = vector.extract_strided_slice %27 {offsets = [1, 0], sizes = [1, 128], strides = [1, 1]} : vector<2x128xf32> to vector<1x128xf32>
    %32 = vector.extract_strided_slice %27 {offsets = [0, 0], sizes = [1, 128], strides = [1, 1]} : vector<2x128xf32> to vector<1x128xf32>
    %33 = arith.subf %31, %32 : vector<1x128xf32>
    %34 = vector.broadcast %29 : vector<8x1xf32> to vector<8x128xf32>
    %35 = vector.broadcast %33 : vector<1x128xf32> to vector<8x128xf32>
    %36 = arith.mulf %34, %35 : vector<8x128xf32>
    %37 = vector.broadcast %30 : vector<1x128xf32> to vector<8x128xf32>
    %38 = arith.addf %37, %36 : vector<8x128xf32>
    %39 = arith.index_cast %11 : i32 to index
    %c0_18 = arith.constant 0 : index
    %c0_19 = arith.constant 0 : index
    %40 = vector.load %arg9[%39, %c0_18, %c0_19] : memref<2x8x128xf32, #tpu.memory_space<vmem>>, vector<1x8x128xf32>
    %41 = vector.shape_cast %40 : vector<1x8x128xf32> to vector<8x128xf32>
    %c0_20 = arith.constant 0 : index
    %c0_21 = arith.constant 0 : index
    %42 = vector.load %arg4[%c0_20, %c0_21] : memref<8x128xf32, #tpu.memory_space<vmem>>, vector<8x128xf32>
    %43 = arith.addf %41, %42 : vector<8x128xf32>
    %44 = arith.addf %43, %38 : vector<8x128xf32>
    %cst = arith.constant dense<0.000000e+00> : vector<8xf32>
    %45 = vector.multi_reduction <add>, %44, %cst [1] : vector<8x128xf32> to vector<8xf32>
    %46 = vector.shape_cast %45 : vector<8xf32> to vector<8x1xf32>
    %47 = arith.mulf %44, %44 : vector<8x128xf32>
    %cst_22 = arith.constant dense<0.000000e+00> : vector<8xf32>
    %48 = vector.multi_reduction <add>, %47, %cst_22 [1] : vector<8x128xf32> to vector<8xf32>
    %49 = vector.shape_cast %48 : vector<8xf32> to vector<8x1xf32>
    %cst_23 = arith.constant 7.812500e-03 : f32
    %50 = vector.broadcast %cst_23 : f32 to vector<8x1xf32>
    %51 = arith.mulf %46, %50 : vector<8x1xf32>
    %cst_24 = arith.constant 7.812500e-03 : f32
    %52 = vector.broadcast %cst_24 : f32 to vector<8x1xf32>
    %53 = arith.mulf %49, %52 : vector<8x1xf32>
    %54 = arith.mulf %51, %51 : vector<8x1xf32>
    %55 = arith.subf %53, %54 : vector<8x1xf32>
    %cst_25 = arith.constant 9.99999996E-13 : f32
    %56 = vector.broadcast %cst_25 : f32 to vector<8x1xf32>
    %57 = arith.addf %55, %56 : vector<8x1xf32>
    %58 = math.rsqrt %57 : vector<8x1xf32>
    %c0_26 = arith.constant 0 : index
    %c0_27 = arith.constant 0 : index
    %59 = vector.load %arg7[%c0_26, %c0_27] : memref<2x128xf32, #tpu.memory_space<vmem>>, vector<2x128xf32>
    %60 = vector.broadcast %51 : vector<8x1xf32> to vector<8x128xf32>
    %61 = arith.subf %44, %60 : vector<8x128xf32>
    %62 = vector.extract_strided_slice %59 {offsets = [0, 0], sizes = [1, 128], strides = [1, 1]} : vector<2x128xf32> to vector<1x128xf32>
    %63 = vector.broadcast %58 : vector<8x1xf32> to vector<8x128xf32>
    %64 = vector.broadcast %62 : vector<1x128xf32> to vector<8x128xf32>
    %65 = arith.mulf %63, %64 : vector<8x128xf32>
    %66 = arith.mulf %61, %65 : vector<8x128xf32>
    %67 = vector.extract_strided_slice %59 {offsets = [1, 0], sizes = [1, 128], strides = [1, 1]} : vector<2x128xf32> to vector<1x128xf32>
    %68 = vector.broadcast %67 : vector<1x128xf32> to vector<8x128xf32>
    %69 = arith.addf %66, %68 : vector<8x128xf32>
    %c0_28 = arith.constant 0 : index
    %c0_29 = arith.constant 0 : index
    %c0_30 = arith.constant 0 : index
    %70 = vector.load %arg8[%c0_28, %c0_29, %c0_30] : memref<1x8x128xf32, #tpu.memory_space<vmem>>, vector<1x8x128xf32>
    %71 = vector.shape_cast %70 : vector<1x8x128xf32> to vector<8x128xf32>
    %72 = vector.shape_cast %69 : vector<8x128xf32> to vector<1x8x128xf32>
    tpu.vector_store %arg8[%c0_28, %c0_29, %c0_30], %72 {strides = array<i32>} : memref<1x8x128xf32, #tpu.memory_space<vmem>>, vector<1x8x128xf32>,
    return
  }
  func.func @transform_1(%arg0: i32, %arg1: i32, %arg2: memref<2x8xi32, #tpu.memory_space<smem>>) -> (i32, i32) {
    %c0_i32 = arith.constant 0 : i32
    %c0_i32_0 = arith.constant 0 : i32
    return %arg0, %c0_i32 : i32, i32
  }
  func.func @transform_2(%arg0: i32, %arg1: i32, %arg2: memref<2x8xi32, #tpu.memory_space<smem>>) -> (i32, i32, i32) {
    %c0_i32 = arith.constant 0 : i32
    %c0_i32_0 = arith.constant 0 : i32
    return %arg1, %arg0, %c0_i32 : i32, i32, i32
  }
  func.func @transform_3(%arg0: i32, %arg1: i32, %arg2: memref<2x8xi32, #tpu.memory_space<smem>>) -> (i32, i32) {
    %c0_i32 = arith.constant 0 : i32
    %c0_i32_0 = arith.constant 0 : i32
    %c0_i32_1 = arith.constant 0 : i32
    return %c0_i32, %c0_i32_0 : i32, i32
  }
  func.func @transform_4(%arg0: i32, %arg1: i32, %arg2: memref<2x8xi32, #tpu.memory_space<smem>>) -> (i32, i32) {
    %c0_i32 = arith.constant 0 : i32
    %c0_i32_0 = arith.constant 0 : i32
    %c0_i32_1 = arith.constant 0 : i32
    return %c0_i32, %c0_i32_0 : i32, i32
  }
  func.func @transform_5(%arg0: i32, %arg1: i32, %arg2: memref<2x8xi32, #tpu.memory_space<smem>>) -> (i32, i32, i32) {
    %c0_i32 = arith.constant 0 : i32
    %c0_i32_0 = arith.constant 0 : i32
    return %arg1, %arg0, %c0_i32 : i32, i32, i32
  }
}

</mosaic_0001>

<bundles_post_ra>
// kernel: tpu_custom_call.1
= control target key start
LH: loop header
LB: loop body
LE: loop exit
PB: predicated region body
PF: predicated region fallthrough
CT: control target
= control target key end

     0   :  { %s2244_s0 = inlined_call_operand.vmem [shape: s32[2,8], index: 0, kind: input, shape index: {}]   ;;  %s2245_s1 = inlined_call_operand.hbm [shape: f32[64,128], index: 1, kind: input, shape index: {}]   ;;  %s2246_s2 = inlined_call_operand.vmem [shape: f32[16,128], index: 2, kind: input, shape index: {}]   ;;  %s2247_s3 = inlined_call_operand.vmem [shape: f32[2,8,1], index: 3, kind: input, shape index: {}]   ;;  %s2248_s4 = inlined_call_operand.vmem [shape: f32[2,128], index: 4, kind: input, shape index: {}]   ;;  %s2249_s5 = inlined_call_operand.vmem [shape: f32[2,128], index: 5, kind: input, shape index: {}]   ;;  %s2250_s6 = inlined_call_operand.hbm [shape: f32[2,8,128], index: 6, kind: output, shape index: {}]  }
   0x1   :  { %2266 = sst [smem:[#allocation72_spill]] %s2247_s3  ;;  %s11_s23 = sshll.u32 %s2244_s0, 4  ;;  %s12_s23 = int_to_ptr.vmem [resolvable:$true] %s11_s23 }
   0x2   :  { %2267 = sst [smem:[#allocation73_spill]] %s2249_s5  ;;  %s1095_s24 = scalar_lea.vmem %s12_s23, 32 }
   0x3   :  { %2268 = sst [smem:[#allocation74_spill]] %s2250_s6  ;;  %p1096_p0 = scmp.ne.s32.totalorder %s12_s23, %s1095_s24 }
   0x4   :  { %p1100_p1 = scmp.lt.s32.totalorder %s12_s23, %s12_s23  ;;  %p1101_p2 = scmp.lt.s32.totalorder %s1095_s24, %s1095_s24 }
   0x6   :  { %p1102_p3 = por %p1101_p2, %p1100_p1 }
   0x8   :  { %p1103_p4 = pnand %p1102_p3, %p1096_p0 }
   0xa   :  { %1106 = shalt.err (!%p1103_p4)  }
   0xb   :  { %s1605_s25 = smov [#allocation5]  }
   0xc   :  { %14 = dma.vmem_to_smem %s12_s23, 32, %s1605_s25, [#allocation4] }
   0xd   :  { %1573 = dma.done.wait [#allocation4], 32 }
   0xe   :  { %1574 = vsyncadd [#allocation4], 4294967264 }
   0xf   :  { %16 = sfence }
  0x10   :  { %17 = vsyncpa [#allocation7], 0 }
  0x11   :  { %19 = vsyncpa [#allocation7 + $0x1], 0  ;;  %s1647_s26 = smov 0   ;;  %s1649_s27 = smov 0  }
  0x12   :  { %s1651_s0 = smov 0   ;;  %s1653_s28 = smov 0  }
  0x13   :  { %s1655_s29 = smov 0   ;;  %s1657_s30 = smov 0  }
  0x14 LB: > { %2269 = sst [smem:[#allocation61_spill]] %s1583_s26  ;;  %s913_s7 = sadd.s32 4294967295, %s1603_s30   ;;  %s1603_s30 = sphi %s1657_s30, %s25_s30   ;;  %s1599_s29 = sphi %s1655_s29, %s2302_s29   ;;  %s1595_s28 = sphi %s1653_s28, %s2301_s28   ;;  %s1591_s0 = sphi %s1651_s0, %s2300_s0   ;;  %s1587_s27 = sphi %s1649_s27, %s2299_s27   ;;  %s1583_s26 = sphi %s1647_s26, %s2298_s26  }
  0x15   : > { %2270 = sst [smem:[#allocation62_spill]] %s1587_s27  ;;  %s914_s8 = sadd.s32 4294967294, %s1603_s30  }
  0x16   : > { %2271 = sst [smem:[#allocation63_spill]] %s1591_s0  ;;  %s34_s9 = sadd.s32 1, %s1599_s29 }
  0x17   : > { %2272 = sst [smem:[#allocation64_spill]] %s1599_s29  ;;  %s142_s10 = sadd.s32 1, %s1591_s0 }
  0x18   : > { %2273 = sst [smem:[#allocation65_spill]] %s1603_s30  ;;  %p35_p5 = scmp.ge.s32.totalorder %s34_s9, 2 }
  0x19   : > { %p152_p6 = scmp.ne.s32.totalorder %s1591_s0, %s1587_s27  ;;  %p153_p7 = scmp.eq.s32.totalorder %s913_s7, 1 }
  0x1a   : > { %p158_p8 = scmp.ne.s32.totalorder %s1587_s27, %s1583_s26  ;;  %s2304_s9 = smov (%p35_p5, %s34_s9), 0 }
  0x1b   : > { %2274 = sst [smem:[#allocation66_spill]] %s2304_s9  ;;  %p1687_p9 = por %p153_p7, %p152_p6 }
  0x1c   : > { %p159_p10 = scmp.eq.s32.totalorder %s914_s8, 1  ;;  %s137_s12 = ssub.s32 %s1599_s29, %s2304_s9 }
  0x1d   : > { %s2275_s11 = scalar_select %p1687_p9, 1, 0 }
  0x1e   : > { %p918_p11 = scmp.ge.s32.totalorder %s1603_s30, 1  ;;  %p140_p12 = scmp.eq.s32.totalorder %s137_s12, 0 }
  0x1f   : > { %2276 = sst [smem:[#allocation67_spill]] %s2275_s11  ;;  %p1694_p13 = por %p159_p10, %p158_p8 }
  0x20   : > { %p200_p0 = scmp.lt.s32.totalorder %s1603_s30, 3 }
  0x21   : > { %s2277_s13 = scalar_select %p1694_p13, 1, 0 }
  0x22   : > { %s1700_s14 = scalar_select %p140_p12, %s1591_s0, %s142_s10  }
  0x23   : > { %2278 = sst [smem:[#allocation68_spill]] %s2277_s13  ;;  %p201_p1 = pnand %p918_p11, %p200_p0 }
  0x24   : > { %2279 = sst [smem:[#allocation69_spill]] %s1700_s14 }
  0x25   : > { %204 = sbr.rel (%p201_p1) target bundleno = 685 (0x2ad), region = 36 }
  0x2a   : > { %s2251_s15 = sand.u32 1, %s1587_s27   ;;  %p236_p2 = scmp.lt.s32.totalorder %s1595_s28, 1 }
  0x2b   : > { %s1706_s16 = sshll.u32 %s2251_s15, 3  ;;  %p245_p3 = scmp.lt.s32.totalorder %s1595_s28, 0 }
  0x2c   : > { %2280 = sst [smem:[#allocation70_spill]] %s1706_s16  ;;  %s246_s17 = ssub.s32 0, %s1595_s28 }
  0x2d   : > { %s237_s18 = scalar_select %p236_p2, %s1595_s28, 1 }
  0x2e   : > { %s921_s19 = smin.u32 %s1595_s28, %s246_s17  ;;  %s2281_s3 = sld [smem:[#allocation72_spill]] }
  0x2f   : > { %s920_s20 = sshll.u32 %s237_s18, 3  ;;  %s248_s21 = sand.u32 1, %s921_s19  }
  0x30   : > { %s249_s25 = ssub.s32 0, %s248_s21  ;;  %p1039_p4 = scmp.eq.s32.totalorder %s1595_s28, 0 }
  0x31   : > { %s2306_s25 = smov (!%p245_p3, %s249_s25), %s248_s21  ;;  %s1719_s7 = sshll.u32 %s1595_s28, 7 }
  0x32   : > { %2282 = sst [smem:[#allocation71_spill]] %s1719_s7  ;;  %p923_p5 = scmp.lt.s32.totalorder %s2306_s25, 0 }
  0x33   : > { %s255_s8 = sadd.s32 2, %s2306_s25  ;;  %s294_s22 = sadd.s32 1, %s1719_s7 }
  0x34   : > { %s1715_s24 = scalar_lea.vmem %s2281_s3, %s920_s20  ;;  %s2308_s8 = smov (!%p923_p5, %s255_s8), %s2306_s25 }
  0x35   : > { %s984_s10 = scalar_select %p1039_p4, [#allocation5], [#allocation42] }
  0x36   : > { %s985_s12 = scalar_select %p1039_p4, %s1719_s7, 0 }
  0x37   : > { %s927_s18 = sshll.u32 %s2308_s8, 3  ;;  %s2310_s22 = smov (!%p1039_p4, %s294_s22), 0 }
  0x38   : > { %s270_s19 = sld [smem:[%s984_s10 + %s985_s12]]  ;;  %s1730_s20 = scalar_lea.vmem [#allocation2], %s927_s18 }
  0x39   : > { %s283_s21 = sshll.u32 %s1730_s20, 4  ;;  %s792_s25 = scalar_lea.vmem %s1730_s20, 1 [#allocation2]  ;;  %s1733_s21 = int_to_ptr.vmem [resolvable:$true] %s283_s21 }
  0x3a   : > { %s987_s23 = scalar_select %p1039_p4, [#allocation5], [#allocation43] }
  0x3b   : > { %s318_s15 = sadd.s32 2, %s1719_s7  ;;  %s307_s18 = sshll.u32 %s792_s25, 4  ;;  %s308_s18 = int_to_ptr.vmem [resolvable:$true] %s307_s18 }
  0x3c   : > { %s1742_s9 = sld [smem:[%s987_s23 + %s2310_s22]]  ;;  %s1748_s29 = scalar_lea.sflag [#allocation3], %s2308_s8 }
  0x3d   : > { %s1755_s26 = scalar_lea.hbm %s2245_s1, 1024 }
  0x3e   : > { %s926_s3 = sshll.u32 %s270_s19, 4 }
  0x3f   : > { %s272_s12 = scalar_lea.hbm %s2245_s1, %s926_s3 }
  0x40   : > { %s1107_s14 = scalar_lea.hbm %s272_s12, 16  ;;  %p1112_p10 = scmp.lt.s32.totalorder %s272_s12, %s2245_s1 }
  0x41   : > { %p1108_p6 = scmp.ne.s32.totalorder %s272_s12, %s1107_s14  ;;  %p1113_p11 = scmp.lt.s32.totalorder %s1755_s26, %s1107_s14 }
  0x43   : > { %p1109_p7 = pnand %p1108_p6, %p1039_p4  ;;  %p1114_p12 = por %p1113_p11, %p1112_p10 }
  0x45   : > { %p1110_p8 = pneg %p1109_p7 }
  0x47   : > { %p1115_p0 = pnand %p1114_p12, %p1110_p8 }
  0x49   : > { %1118 = shalt.err (!%p1115_p0)  }
  0x4a   : > { %s1119_s3 = scalar_lea.vmem %s1733_s21, 16  ;;  %s1606_s0 = smov [#allocation2]  }
  0x4b   : > { %p1120_p1 = scmp.ne.s32.totalorder %s1733_s21, %s1119_s3  ;;  %s1123_s13 = sshll.u32 %s1606_s0, 4  ;;  %s1765_s13 = int_to_ptr.vmem [resolvable:$false] %s1123_s13 }
  0x4c   : > { %s1768_s17 = scalar_lea.vmem %s1765_s13, 256  ;;  %p1126_p5 = scmp.lt.s32.totalorder %s1733_s21, %s1765_s13 }
  0x4d   : > { %p1121_p2 = pnand %p1120_p1, %p1039_p4  ;;  %p1127_p6 = scmp.lt.s32.totalorder %s1768_s17, %s1119_s3 }
  0x4f   : > { %p1122_p3 = pneg %p1121_p2  ;;  %p1128_p7 = por %p1127_p6, %p1126_p5 }
  0x51   : > { %p1129_p8 = pnand %p1128_p7, %p1122_p3 }
  0x53   : > { %1132 = shalt.err (!%p1129_p8)  }
  0x54   : > { %986 = dma.hbm_to_vmem [thread:$0]  (%p1039_p4), %s272_s12, 16, %s1733_s21, %s1748_s29 }
  0x55   : > { %s797_s14 = scalar_lea.vmem %s1730_s20, 2 [#allocation2]  ;;  %s2312_s15 = smov (!%p1039_p4, %s318_s15), 0 }
  0x56   : > { %s990_s23 = scalar_select %p1039_p4, [#allocation5], [#allocation44] }
  0x57   : > { %s929_s25 = sshll.u32 %s1742_s9, 4  ;;  %s331_s10 = sshll.u32 %s797_s14, 4  ;;  %s1803_s10 = int_to_ptr.vmem [resolvable:$true] %s331_s10 }
  0x58   : > { %s297_s3 = scalar_lea.hbm %s2245_s1, %s929_s25  ;;  %s1788_s0 = sld [smem:[%s990_s23 + %s2312_s15]] }
  0x59   : > { %s1133_s30 = scalar_lea.hbm %s297_s3, 16  ;;  %p1138_p0 = scmp.lt.s32.totalorder %s297_s3, %s2245_s1 }
  0x5a   : > { %p1134_p10 = scmp.ne.s32.totalorder %s297_s3, %s1133_s30  ;;  %p1139_p1 = scmp.lt.s32.totalorder %s1755_s26, %s1133_s30 }
  0x5c   : > { %p1135_p11 = pnand %p1134_p10, %p1039_p4  ;;  %p1140_p2 = por %p1139_p1, %p1138_p0 }
  0x5e   : > { %p1136_p12 = pneg %p1135_p11 }
  0x60   : > { %p1141_p3 = pnand %p1140_p2, %p1136_p12 }
  0x62   : > { %1144 = shalt.err (!%p1141_p3)  }
  0x63   : > { %s1145_s9 = scalar_lea.vmem %s308_s18, 16  ;;  %p1152_p8 = scmp.lt.s32.totalorder %s308_s18, %s1765_s13 }
  0x64   : > { %p1146_p5 = scmp.ne.s32.totalorder %s308_s18, %s1145_s9  ;;  %p1153_p13 = scmp.lt.s32.totalorder %s1768_s17, %s1145_s9 }
  0x66   : > { %p1147_p6 = pnand %p1146_p5, %p1039_p4  ;;  %p1154_p10 = por %p1153_p13, %p1152_p8 }
  0x68   : > { %p1148_p7 = pneg %p1147_p6 }
  0x6a   : > { %p1155_p11 = pnand %p1154_p10, %p1148_p7 }
  0x6c   : > { %1158 = shalt.err (!%p1155_p11)  }
  0x6d   : > { %989 = dma.hbm_to_vmem [thread:$0]  (%p1039_p4), %s297_s3, 16, %s308_s18, %s1748_s29 }
  0x6e   : > { %s342_s30 = sadd.s32 3, %s1719_s7  ;;  %s802_s14 = scalar_lea.vmem %s1730_s20, 3 [#allocation2] }
  0x6f   : > { %s993_s15 = scalar_select %p1039_p4, [#allocation5], [#allocation45] }
  0x70   : > { %s2314_s30 = smov (!%p1039_p4, %s342_s30), 0  ;;  %s366_s23 = sadd.s32 4, %s1719_s7 }
  0x71   : > { %s932_s25 = sshll.u32 %s1788_s0, 4  ;;  %s1813_s19 = sld [smem:[%s993_s15 + %s2314_s30]] }
  0x72   : > { %s321_s12 = scalar_lea.hbm %s2245_s1, %s932_s25  ;;  %s355_s9 = sshll.u32 %s802_s14, 4  ;;  %s356_s9 = int_to_ptr.vmem [resolvable:$true] %s355_s9 }
  0x73   : > { %s1159_s6 = scalar_lea.hbm %s321_s12, 16  ;;  %p1164_p1 = scmp.lt.s32.totalorder %s321_s12, %s2245_s1 }
  0x74   : > { %p1160_p13 = scmp.ne.s32.totalorder %s321_s12, %s1159_s6  ;;  %p1165_p2 = scmp.lt.s32.totalorder %s1755_s26, %s1159_s6 }
  0x76   : > { %p1161_p12 = pnand %p1160_p13, %p1039_p4  ;;  %p1166_p3 = por %p1165_p2, %p1164_p1 }
  0x78   : > { %p1162_p0 = pneg %p1161_p12 }
  0x7a   : > { %p1167_p5 = pnand %p1166_p3, %p1162_p0 }
  0x7c   : > { %1170 = shalt.err (!%p1167_p5)  }
  0x7d   : > { %s1171_s0 = scalar_lea.vmem %s1803_s10, 16  ;;  %p1178_p10 = scmp.lt.s32.totalorder %s1803_s10, %s1765_s13 }
  0x7e   : > { %p1172_p6 = scmp.ne.s32.totalorder %s1803_s10, %s1171_s0  ;;  %p1179_p11 = scmp.lt.s32.totalorder %s1768_s17, %s1171_s0 }
  0x80   : > { %p1173_p7 = pnand %p1172_p6, %p1039_p4  ;;  %p1180_p13 = por %p1179_p11, %p1178_p10 }
  0x82   : > { %p1174_p8 = pneg %p1173_p7 }
  0x84   : > { %p1181_p12 = pnand %p1180_p13, %p1174_p8 }
  0x86   : > { %1184 = shalt.err (!%p1181_p12)  }
  0x87   : > { %992 = dma.hbm_to_vmem [thread:$0]  (%p1039_p4), %s321_s12, 16, %s1803_s10, %s1748_s29 }
  0x88   : > { %s807_s6 = scalar_lea.vmem %s1730_s20, 4 [#allocation2]  ;;  %s2316_s23 = smov (!%p1039_p4, %s366_s23), 0 }
  0x89   : > { %s996_s30 = scalar_select %p1039_p4, [#allocation5], [#allocation46] }
  0x8a   : > { %s935_s15 = sshll.u32 %s1813_s19, 4  ;;  %s379_s14 = sshll.u32 %s807_s6, 4  ;;  %s1859_s14 = int_to_ptr.vmem [resolvable:$true] %s379_s14 }
  0x8b   : > { %s345_s21 = scalar_lea.hbm %s2245_s1, %s935_s15  ;;  %s1844_s18 = sld [smem:[%s996_s30 + %s2316_s23]] }
  0x8c   : > { %s1185_s3 = scalar_lea.hbm %s345_s21, 16  ;;  %p1190_p3 = scmp.lt.s32.totalorder %s345_s21, %s2245_s1 }
  0x8d   : > { %p1186_p0 = scmp.ne.s32.totalorder %s345_s21, %s1185_s3  ;;  %p1191_p5 = scmp.lt.s32.totalorder %s1755_s26, %s1185_s3 }
  0x8f   : > { %p1187_p1 = pnand %p1186_p0, %p1039_p4  ;;  %p1192_p6 = por %p1191_p5, %p1190_p3 }
  0x91   : > { %p1188_p2 = pneg %p1187_p1 }
  0x93   : > { %p1193_p7 = pnand %p1192_p6, %p1188_p2 }
  0x95   : > { %1196 = shalt.err (!%p1193_p7)  }
  0x96   : > { %s1197_s19 = scalar_lea.vmem %s356_s9, 16  ;;  %p1204_p13 = scmp.lt.s32.totalorder %s356_s9, %s1765_s13 }
  0x97   : > { %p1198_p8 = scmp.ne.s32.totalorder %s356_s9, %s1197_s19  ;;  %p1205_p12 = scmp.lt.s32.totalorder %s1768_s17, %s1197_s19 }
  0x99   : > { %p1199_p10 = pnand %p1198_p8, %p1039_p4  ;;  %p1206_p0 = por %p1205_p12, %p1204_p13 }
  0x9b   : > { %p1200_p11 = pneg %p1199_p10 }
  0x9d   : > { %p1207_p1 = pnand %p1206_p0, %p1200_p11 }
  0x9f   : > { %1210 = shalt.err (!%p1207_p1)  }
  0xa0   : > { %995 = dma.hbm_to_vmem [thread:$0]  (%p1039_p4), %s345_s21, 16, %s356_s9, %s1748_s29 }
  0xa1   : > { %s390_s23 = sadd.s32 5, %s1719_s7  ;;  %s812_s6 = scalar_lea.vmem %s1730_s20, 5 [#allocation2] }
  0xa2   : > { %s999_s0 = scalar_select %p1039_p4, [#allocation5], [#allocation47] }
  0xa3   : > { %s2318_s23 = smov (!%p1039_p4, %s390_s23), 0  ;;  %s414_s30 = sadd.s32 6, %s1719_s7 }
  0xa4   : > { %s938_s15 = sshll.u32 %s1844_s18, 4  ;;  %s391_s25 = sld [smem:[%s999_s0 + %s2318_s23]] }
  0xa5   : > { %s369_s10 = scalar_lea.hbm %s2245_s1, %s938_s15  ;;  %s403_s12 = sshll.u32 %s812_s6, 4  ;;  %s404_s12 = int_to_ptr.vmem [resolvable:$true] %s403_s12 }
  0xa6   : > { %s1211_s19 = scalar_lea.hbm %s369_s10, 16  ;;  %p1216_p6 = scmp.lt.s32.totalorder %s369_s10, %s2245_s1 }
  0xa7   : > { %p1212_p2 = scmp.ne.s32.totalorder %s369_s10, %s1211_s19  ;;  %p1217_p7 = scmp.lt.s32.totalorder %s1755_s26, %s1211_s19 }
  0xa9   : > { %p1213_p3 = pnand %p1212_p2, %p1039_p4  ;;  %p1218_p8 = por %p1217_p7, %p1216_p6 }
  0xab   : > { %p1214_p5 = pneg %p1213_p3 }
  0xad   : > { %p1219_p10 = pnand %p1218_p8, %p1214_p5 }
  0xaf   : > { %1222 = shalt.err (!%p1219_p10)  }
  0xb0   : > { %s1223_s18 = scalar_lea.vmem %s1859_s14, 16  ;;  %p1230_p0 = scmp.lt.s32.totalorder %s1859_s14, %s1765_s13 }
  0xb1   : > { %p1224_p11 = scmp.ne.s32.totalorder %s1859_s14, %s1223_s18  ;;  %p1231_p1 = scmp.lt.s32.totalorder %s1768_s17, %s1223_s18 }
  0xb3   : > { %p1225_p13 = pnand %p1224_p11, %p1039_p4  ;;  %p1232_p2 = por %p1231_p1, %p1230_p0 }
  0xb5   : > { %p1226_p12 = pneg %p1225_p13 }
  0xb7   : > { %p1233_p3 = pnand %p1232_p2, %p1226_p12 }
  0xb9   : > { %1236 = shalt.err (!%p1233_p3)  }
  0xba   : > { %998 = dma.hbm_to_vmem [thread:$0]  (%p1039_p4), %s369_s10, 16, %s1859_s14, %s1748_s29 }
  0xbb   : > { %s1002_s23 = scalar_select %p1039_p4, [#allocation5], [#allocation48] }
  0xbc   : > { %s2320_s30 = smov (!%p1039_p4, %s414_s30), 0  ;;  %s941_s0 = sshll.u32 %s391_s25, 4 }
  0xbd   : > { %s817_s6 = scalar_lea.vmem %s1730_s20, 6 [#allocation2]  ;;  %s393_s3 = scalar_lea.hbm %s2245_s1, %s941_s0 }
  0xbe   : > { %s1897_s19 = sld [smem:[%s1002_s23 + %s2320_s30]]  ;;  %s1237_s9 = scalar_lea.hbm %s393_s3, 16 }
  0xbf   : > { %p1238_p5 = scmp.ne.s32.totalorder %s393_s3, %s1237_s9  ;;  %p1242_p8 = scmp.lt.s32.totalorder %s393_s3, %s2245_s1 }
  0xc0   : > { %p1243_p10 = scmp.lt.s32.totalorder %s1755_s26, %s1237_s9 }
  0xc1   : > { %p1239_p6 = pnand %p1238_p5, %p1039_p4 }
  0xc2   : > { %p1244_p11 = por %p1243_p10, %p1242_p8 }
  0xc3   : > { %p1240_p7 = pneg %p1239_p6 }
  0xc5   : > { %p1245_p13 = pnand %p1244_p11, %p1240_p7 }
  0xc7   : > { %1248 = shalt.err (!%p1245_p13)  }
  0xc8   : > { %s1249_s25 = scalar_lea.vmem %s404_s12, 16  ;;  %p1256_p2 = scmp.lt.s32.totalorder %s404_s12, %s1765_s13 }
  0xc9   : > { %p1250_p12 = scmp.ne.s32.totalorder %s404_s12, %s1249_s25  ;;  %p1257_p3 = scmp.lt.s32.totalorder %s1768_s17, %s1249_s25 }
  0xcb   : > { %p1251_p0 = pnand %p1250_p12, %p1039_p4  ;;  %p1258_p5 = por %p1257_p3, %p1256_p2 }
  0xcd   : > { %p1252_p1 = pneg %p1251_p0 }
  0xcf   : > { %p1259_p6 = pnand %p1258_p5, %p1252_p1 }
  0xd1   : > { %1262 = shalt.err (!%p1259_p6)  }
  0xd2   : > { %1001 = dma.hbm_to_vmem [thread:$0]  (%p1039_p4), %s393_s3, 16, %s404_s12, %s1748_s29 }
  0xd3   : > { %s427_s30 = sshll.u32 %s817_s6, 4  ;;  %s438_s10 = sadd.s32 7, %s1719_s7  ;;  %s428_s30 = int_to_ptr.vmem [resolvable:$true] %s427_s30 }
  0xd4   : > { %s1005_s18 = scalar_select %p1039_p4, [#allocation5], [#allocation49] }
  0xd5   : > { %s2322_s10 = smov (!%p1039_p4, %s438_s10), 0  ;;  %s822_s23 = scalar_lea.vmem %s1730_s20, 7 [#allocation2] }
  0xd6   : > { %s944_s0 = sshll.u32 %s1897_s19, 4  ;;  %s439_s15 = sld [smem:[%s1005_s18 + %s2322_s10]] }
  0xd7   : > { %s417_s21 = scalar_lea.hbm %s2245_s1, %s944_s0  ;;  %s451_s14 = sshll.u32 %s822_s23, 4  ;;  %s452_s14 = int_to_ptr.vmem [resolvable:$true] %s451_s14 }
  0xd8   : > { %s1263_s25 = scalar_lea.hbm %s417_s21, 16  ;;  %p1268_p11 = scmp.lt.s32.totalorder %s417_s21, %s2245_s1 }
  0xd9   : > { %p1264_p7 = scmp.ne.s32.totalorder %s417_s21, %s1263_s25  ;;  %p1269_p13 = scmp.lt.s32.totalorder %s1755_s26, %s1263_s25 }
  0xdb   : > { %p1265_p8 = pnand %p1264_p7, %p1039_p4  ;;  %p1270_p12 = por %p1269_p13, %p1268_p11 }
  0xdd   : > { %p1266_p10 = pneg %p1265_p8 }
  0xdf   : > { %p1271_p0 = pnand %p1270_p12, %p1266_p10 }
  0xe1   : > { %1274 = shalt.err (!%p1271_p0)  }
  0xe2   : > { %s1275_s3 = scalar_lea.vmem %s428_s30, 16  ;;  %p1282_p5 = scmp.lt.s32.totalorder %s428_s30, %s1765_s13 }
  0xe3   : > { %p1276_p1 = scmp.ne.s32.totalorder %s428_s30, %s1275_s3  ;;  %p1283_p6 = scmp.lt.s32.totalorder %s1768_s17, %s1275_s3 }
  0xe5   : > { %p1277_p2 = pnand %p1276_p1, %p1039_p4  ;;  %p1284_p7 = por %p1283_p6, %p1282_p5 }
  0xe7   : > { %p1278_p3 = pneg %p1277_p2 }
  0xe9   : > { %p1285_p8 = pnand %p1284_p7, %p1278_p3 }
  0xeb   : > { %1288 = shalt.err (!%p1285_p8)  }
  0xec   : > { %1004 = dma.hbm_to_vmem [thread:$0]  (%p1039_p4), %s417_s21, 16, %s428_s30, %s1748_s29 }
  0xed   : > { %s947_s19 = sshll.u32 %s439_s15, 4 }
  0xee   : > { %s441_s23 = scalar_lea.hbm %s2245_s1, %s947_s19 }
  0xef   : > { %s1289_s0 = scalar_lea.hbm %s441_s23, 16  ;;  %p1294_p12 = scmp.lt.s32.totalorder %s441_s23, %s2245_s1 }
  0xf0   : > { %p1290_p10 = scmp.ne.s32.totalorder %s441_s23, %s1289_s0  ;;  %p1295_p0 = scmp.lt.s32.totalorder %s1755_s26, %s1289_s0 }
  0xf2   : > { %p1291_p11 = pnand %p1290_p10, %p1039_p4  ;;  %p1296_p1 = por %p1295_p0, %p1294_p12 }
  0xf4   : > { %p1292_p13 = pneg %p1291_p11 }
  0xf6   : > { %p1297_p2 = pnand %p1296_p1, %p1292_p13 }
  0xf8   : > { %1300 = shalt.err (!%p1297_p2)  }
  0xf9   : > { %s1301_s30 = scalar_lea.vmem %s452_s14, 16  ;;  %p1308_p7 = scmp.lt.s32.totalorder %s452_s14, %s1765_s13 }
  0xfa   : > { %p1302_p3 = scmp.ne.s32.totalorder %s452_s14, %s1301_s30  ;;  %p1309_p8 = scmp.lt.s32.totalorder %s1768_s17, %s1301_s30 }
  0xfc   : > { %p1303_p5 = pnand %p1302_p3, %p1039_p4  ;;  %p1310_p10 = por %p1309_p8, %p1308_p7 }
  0xfe   : > { %p1304_p6 = pneg %p1303_p5 }
 0x100   : > { %p1311_p11 = pnand %p1310_p10, %p1304_p6 }
 0x102   : > { %1314 = shalt.err (!%p1311_p11)  }
 0x103   : > { %1007 = dma.hbm_to_vmem [thread:$0]  (%p1039_p4), %s441_s23, 16, %s452_s14, %s1748_s29 }
 0x104   : > { %1575 = dma.done.wait %s1748_s29, 128 }
 0x105   : > { %1576 = vsyncadd %s1748_s29, 4294967168  ;;  %p1040_p13 = scmp.ne.s32.totalorder %s1595_s28, 1  ;;  %v1607_v0 = vmov 0   ;;  %s468_s21 = sadd.s32 1, %s1595_s28  ;;  %v667_v1 = vld [vmem:[%s1715_s24] sm:$0xff] }
 0x106   : > { %1092 = vset.pattern.permute.xlu0 %v1607_v0  ;;  %s2283_s25 = ssub.s32 1, %s2308_s8  ;;  %p469_p12 = scmp.eq.s32.totalorder %s468_s21, 2 }
 0x107   : > { %s954_s12 = sshll.u32 %s2283_s25, 3  ;;  %674 = vperm.xlu0 %1092, %v667_v1  }
 0x108   : > { %s1009_s6 = scalar_select %p1040_p13, [#allocation5], [#allocation50] }
 0x109   : > { %s2324_s21 = smov (%p469_p12, %s468_s21), 0  ;;  %s1965_s3 = scalar_lea.vmem [#allocation2], %s954_s12 }
 0x10a   : > { %s472_s29 = scalar_select %p469_p12, 1, 0 }
 0x10b   : > { %s494_s19 = sshll.u32 %s1965_s3, 4  ;;  %s495_s19 = int_to_ptr.vmem [resolvable:$true] %s494_s19 }
 0x10c   : > { %s1963_s14 = sshll.u32 %s472_s29, 3 }
 0x10d   : > { %s474_s10 = sshra.s32 %s1963_s14, 7  ;;  %s479_s18 = sand.u32 127, %s1963_s14 }
 0x10e   : > { %s476_s23 = sadd.s32 %s474_s10, %s2324_s21  ;;  %s498_s0 = sadd.s32 1, %s1963_s14 }
 0x10f   : > { %s952_s22 = sshll.u32 %s476_s23, 7  ;;  %s499_s24 = sshra.s32 %s498_s0, 7 }
 0x110   : > { %s480_s9 = sadd.s32 %s952_s22, %s479_s18  ;;  %s501_s30 = sadd.s32 %s499_s24, %s2324_s21 }
 0x111   : > { %s2326_s9 = smov (!%p1040_p13, %s480_s9), 0  ;;  %s955_s25 = sshll.u32 %s501_s30, 7 }
 0x112   : > { %s504_s12 = sand.u32 127, %s498_s0  ;;  %s481_s29 = sld [smem:[%s1009_s6 + %s2326_s9]] }
 0x113   : > { %s505_s15 = sadd.s32 %s955_s25, %s504_s12  ;;  %s835_s10 = scalar_lea.vmem %s1965_s3, 1 [#allocation2] }
 0x114   : > { %s1012_s11 = scalar_select %p1040_p13, [#allocation5], [#allocation51] }
 0x115   : > { %s2328_s15 = smov (!%p1040_p13, %s505_s15), 0  ;;  %s522_s23 = sadd.s32 2, %s1963_s14 }
 0x116   : > { %s1981_s5 = sld [smem:[%s1012_s11 + %s2328_s15]]  ;;  %s518_s18 = sshll.u32 %s835_s10, 4  ;;  %s519_s18 = int_to_ptr.vmem [resolvable:$true] %s518_s18 }
 0x117   : > { %s523_s22 = sshra.s32 %s522_s23, 7  ;;  %s2284_s25 = ssub.s32 1, %s2308_s8 }
 0x118   : > { %s953_s24 = sshll.u32 %s481_s29, 4  ;;  %s525_s30 = sadd.s32 %s523_s22, %s2324_s21 }
 0x119   : > { %s483_s6 = scalar_lea.hbm %s2245_s1, %s953_s24  ;;  %s1989_s9 = sshll.u32 %s525_s30, 7 }
 0x11a   : > { %s1993_s12 = scalar_lea.sflag [#allocation3], %s2284_s25  ;;  %s1315_s7 = scalar_lea.hbm %s483_s6, 16 }
 0x11b   : > { %p1316_p4 = scmp.ne.s32.totalorder %s483_s6, %s1315_s7  ;;  %p1320_p2 = scmp.lt.s32.totalorder %s483_s6, %s2245_s1 }
 0x11c   : > { %p1321_p3 = scmp.lt.s32.totalorder %s1755_s26, %s1315_s7 }
 0x11d   : > { %p1317_p0 = pnand %p1316_p4, %p1040_p13 }
 0x11e   : > { %p1322_p5 = por %p1321_p3, %p1320_p2 }
 0x11f   : > { %p1318_p1 = pneg %p1317_p0 }
 0x121   : > { %p1323_p6 = pnand %p1322_p5, %p1318_p1 }
 0x123   : > { %1326 = shalt.err (!%p1323_p6)  }
 0x124   : > { %s1327_s27 = scalar_lea.vmem %s495_s19, 16  ;;  %p1334_p11 = scmp.lt.s32.totalorder %s495_s19, %s1765_s13 }
 0x125   : > { %p1328_p7 = scmp.ne.s32.totalorder %s495_s19, %s1327_s27  ;;  %p1335_p12 = scmp.lt.s32.totalorder %s1768_s17, %s1327_s27 }
 0x127   : > { %p1329_p8 = pnand %p1328_p7, %p1040_p13  ;;  %p1336_p4 = por %p1335_p12, %p1334_p11 }
 0x129   : > { %p1330_p10 = pneg %p1329_p8 }
 0x12b   : > { %p1337_p0 = pnand %p1336_p4, %p1330_p10 }
 0x12d   : > { %1340 = shalt.err (!%p1337_p0)  }
 0x12e   : > { %1011 = dma.hbm_to_vmem [thread:$0]  (%p1040_p13), %s483_s6, 16, %s495_s19, %s1993_s12 }
 0x12f   : > { %s528_s7 = sand.u32 127, %s522_s23  ;;  %s956_s8 = sshll.u32 %s1981_s5, 4 }
 0x130   : > { %s840_s29 = scalar_lea.vmem %s1965_s3, 2 [#allocation2]  ;;  %s508_s24 = scalar_lea.hbm %s2245_s1, %s956_s8 }
 0x131   : > { %s529_s30 = sadd.s32 %s1989_s9, %s528_s7  ;;  %s1341_s0 = scalar_lea.hbm %s508_s24, 16 }
 0x132   : > { %p1342_p1 = scmp.ne.s32.totalorder %s508_s24, %s1341_s0  ;;  %p1346_p5 = scmp.lt.s32.totalorder %s508_s24, %s2245_s1 }
 0x133   : > { %p1347_p6 = scmp.lt.s32.totalorder %s1755_s26, %s1341_s0 }
 0x134   : > { %p1343_p2 = pnand %p1342_p1, %p1040_p13 }
 0x135   : > { %p1348_p7 = por %p1347_p6, %p1346_p5 }
 0x136   : > { %p1344_p3 = pneg %p1343_p2 }
 0x138   : > { %p1349_p8 = pnand %p1348_p7, %p1344_p3 }
 0x13a   : > { %1352 = shalt.err (!%p1349_p8)  }
 0x13b   : > { %s1353_s5 = scalar_lea.vmem %s519_s18, 16  ;;  %p1360_p4 = scmp.lt.s32.totalorder %s519_s18, %s1765_s13 }
 0x13c   : > { %p1354_p10 = scmp.ne.s32.totalorder %s519_s18, %s1353_s5  ;;  %p1361_p0 = scmp.lt.s32.totalorder %s1768_s17, %s1353_s5 }
 0x13e   : > { %p1355_p11 = pnand %p1354_p10, %p1040_p13  ;;  %p1362_p1 = por %p1361_p0, %p1360_p4 }
 0x140   : > { %p1356_p12 = pneg %p1355_p11 }
 0x142   : > { %p1363_p2 = pnand %p1362_p1, %p1356_p12 }
 0x144   : > { %1366 = shalt.err (!%p1363_p2)  }
 0x145   : > { %1014 = dma.hbm_to_vmem [thread:$0]  (%p1040_p13), %s508_s24, 16, %s519_s18, %s1993_s12 }
 0x146   : > { %s1015_s19 = scalar_select %p1040_p13, [#allocation5], [#allocation52] }
 0x147   : > { %s2330_s30 = smov (!%p1040_p13, %s529_s30), 0  ;;  %s542_s23 = sshll.u32 %s840_s29, 4  ;;  %s2035_s23 = int_to_ptr.vmem [resolvable:$true] %s542_s23 }
 0x148   : > { %s546_s6 = sadd.s32 3, %s1963_s14  ;;  %s530_s9 = sld [smem:[%s1015_s19 + %s2330_s30]] }
 0x149   : > { %s547_s15 = sshra.s32 %s546_s6, 7  ;;  %s552_s7 = sand.u32 127, %s546_s6 }
 0x14a   : > { %s549_s27 = sadd.s32 %s547_s15, %s2324_s21  ;;  %s845_s22 = scalar_lea.vmem %s1965_s3, 3 [#allocation2] }
 0x14b   : > { %s961_s8 = sshll.u32 %s549_s27, 7  ;;  %s566_s24 = sshll.u32 %s845_s22, 4  ;;  %s567_s24 = int_to_ptr.vmem [resolvable:$true] %s566_s24 }
 0x14c   : > { %s553_s10 = sadd.s32 %s961_s8, %s552_s7 }
 0x14d   : > { %s1018_s0 = scalar_select %p1040_p13, [#allocation5], [#allocation53] }
 0x14e   : > { %s2332_s10 = smov (!%p1040_p13, %s553_s10), 0  ;;  %s959_s18 = sshll.u32 %s530_s9, 4 }
 0x14f   : > { %s532_s30 = scalar_lea.hbm %s2245_s1, %s959_s18  ;;  %s2045_s11 = sld [smem:[%s1018_s0 + %s2332_s10]] }
 0x150   : > { %s1367_s5 = scalar_lea.hbm %s532_s30, 16  ;;  %p1372_p7 = scmp.lt.s32.totalorder %s532_s30, %s2245_s1 }
 0x151   : > { %p1368_p3 = scmp.ne.s32.totalorder %s532_s30, %s1367_s5  ;;  %p1373_p8 = scmp.lt.s32.totalorder %s1755_s26, %s1367_s5 }
 0x153   : > { %p1369_p5 = pnand %p1368_p3, %p1040_p13  ;;  %p1374_p10 = por %p1373_p8, %p1372_p7 }
 0x155   : > { %p1370_p6 = pneg %p1369_p5 }
 0x157   : > { %p1375_p11 = pnand %p1374_p10, %p1370_p6 }
 0x159   : > { %1378 = shalt.err (!%p1375_p11)  }
 0x15a   : > { %s1379_s9 = scalar_lea.vmem %s2035_s23, 16  ;;  %p1386_p1 = scmp.lt.s32.totalorder %s2035_s23, %s1765_s13 }
 0x15b   : > { %p1380_p12 = scmp.ne.s32.totalorder %s2035_s23, %s1379_s9  ;;  %p1387_p2 = scmp.lt.s32.totalorder %s1768_s17, %s1379_s9 }
 0x15d   : > { %p1381_p4 = pnand %p1380_p12, %p1040_p13  ;;  %p1388_p3 = por %p1387_p2, %p1386_p1 }
 0x15f   : > { %p1382_p0 = pneg %p1381_p4 }
 0x161   : > { %p1389_p5 = pnand %p1388_p3, %p1382_p0 }
 0x163   : > { %1392 = shalt.err (!%p1389_p5)  }
 0x164   : > { %1017 = dma.hbm_to_vmem [thread:$0]  (%p1040_p13), %s532_s30, 16, %s2035_s23, %s1993_s12 }
 0x165   : > { %s570_s15 = sadd.s32 4, %s1963_s14  ;;  %s850_s27 = scalar_lea.vmem %s1965_s3, 4 [#allocation2] }
 0x166   : > { %s571_s7 = sshra.s32 %s570_s15, 7  ;;  %s2066_s8 = sand.u32 127, %s570_s15 }
 0x167   : > { %s573_s10 = sadd.s32 %s571_s7, %s2324_s21  ;;  %s2069_s0 = sshll.u32 %s850_s27, 4  ;;  %s2096_s0 = int_to_ptr.vmem [resolvable:$true] %s2069_s0 }
 0x168   : > { %s964_s22 = sshll.u32 %s573_s10, 7  ;;  %s962_s18 = sshll.u32 %s2045_s11, 4 }
 0x169   : > { %s577_s25 = sadd.s32 %s964_s22, %s2066_s8  ;;  %s556_s19 = scalar_lea.hbm %s2245_s1, %s962_s18 }
 0x16a   : > { %s594_s6 = sadd.s32 5, %s1963_s14  ;;  %s1393_s23 = scalar_lea.hbm %s556_s19, 16 }
 0x16b   : > { %p1394_p6 = scmp.ne.s32.totalorder %s556_s19, %s1393_s23  ;;  %p1398_p10 = scmp.lt.s32.totalorder %s556_s19, %s2245_s1 }
 0x16c   : > { %p1399_p11 = scmp.lt.s32.totalorder %s1755_s26, %s1393_s23 }
 0x16d   : > { %p1395_p7 = pnand %p1394_p6, %p1040_p13 }
 0x16e   : > { %p1400_p12 = por %p1399_p11, %p1398_p10 }
 0x16f   : > { %p1396_p8 = pneg %p1395_p7 }
 0x171   : > { %p1401_p4 = pnand %p1400_p12, %p1396_p8 }
 0x173   : > { %1404 = shalt.err (!%p1401_p4)  }
 0x174   : > { %s1405_s11 = scalar_lea.vmem %s567_s24, 16  ;;  %p1412_p3 = scmp.lt.s32.totalorder %s567_s24, %s1765_s13 }
 0x175   : > { %p1406_p0 = scmp.ne.s32.totalorder %s567_s24, %s1405_s11  ;;  %p1413_p5 = scmp.lt.s32.totalorder %s1768_s17, %s1405_s11 }
 0x177   : > { %p1407_p1 = pnand %p1406_p0, %p1040_p13  ;;  %p1414_p6 = por %p1413_p5, %p1412_p3 }
 0x179   : > { %p1408_p2 = pneg %p1407_p1 }
 0x17b   : > { %p1415_p7 = pnand %p1414_p6, %p1408_p2 }
 0x17d   : > { %1418 = shalt.err (!%p1415_p7)  }
 0x17e   : > { %1020 = dma.hbm_to_vmem [thread:$0]  (%p1040_p13), %s556_s19, 16, %s567_s24, %s1993_s12 }
 0x17f   : > { %s1021_s15 = scalar_select %p1040_p13, [#allocation5], [#allocation54] }
 0x180   : > { %s2334_s25 = smov (!%p1040_p13, %s577_s25), 0  ;;  %s595_s27 = sshra.s32 %s594_s6, 7 }
 0x181   : > { %s600_s7 = sand.u32 127, %s594_s6  ;;  %s578_s8 = sld [smem:[%s1021_s15 + %s2334_s25]] }
 0x182   : > { %s597_s10 = sadd.s32 %s595_s27, %s2324_s21  ;;  %s855_s29 = scalar_lea.vmem %s1965_s3, 5 [#allocation2] }
 0x183   : > { %s967_s22 = sshll.u32 %s597_s10, 7  ;;  %s614_s24 = sshll.u32 %s855_s29, 4  ;;  %s615_s24 = int_to_ptr.vmem [resolvable:$true] %s614_s24 }
 0x184   : > { %s601_s18 = sadd.s32 %s967_s22, %s600_s7  ;;  %s618_s19 = sadd.s32 6, %s1963_s14 }
 0x185   : > { %s1024_s5 = scalar_select %p1040_p13, [#allocation5], [#allocation55] }
 0x186   : > { %s2336_s18 = smov (!%p1040_p13, %s601_s18), 0  ;;  %s619_s11 = sshra.s32 %s618_s19, 7 }
 0x187   : > { %s965_s23 = sshll.u32 %s578_s8, 4  ;;  %s2104_s30 = sld [smem:[%s1024_s5 + %s2336_s18]] }
 0x188   : > { %s580_s25 = scalar_lea.hbm %s2245_s1, %s965_s23 }
 0x189   : > { %s1419_s15 = scalar_lea.hbm %s580_s25, 16  ;;  %p1424_p12 = scmp.lt.s32.totalorder %s580_s25, %s2245_s1 }
 0x18a   : > { %p1420_p8 = scmp.ne.s32.totalorder %s580_s25, %s1419_s15  ;;  %p1425_p4 = scmp.lt.s32.totalorder %s1755_s26, %s1419_s15 }
 0x18c   : > { %p1421_p10 = pnand %p1420_p8, %p1040_p13  ;;  %p1426_p0 = por %p1425_p4, %p1424_p12 }
 0x18e   : > { %p1422_p11 = pneg %p1421_p10 }
 0x190   : > { %p1427_p1 = pnand %p1426_p0, %p1422_p11 }
 0x192   : > { %1430 = shalt.err (!%p1427_p1)  }
 0x193   : > { %s1431_s8 = scalar_lea.vmem %s2096_s0, 16  ;;  %p1438_p6 = scmp.lt.s32.totalorder %s2096_s0, %s1765_s13 }
 0x194   : > { %p1432_p2 = scmp.ne.s32.totalorder %s2096_s0, %s1431_s8  ;;  %p1439_p7 = scmp.lt.s32.totalorder %s1768_s17, %s1431_s8 }
 0x196   : > { %p1433_p3 = pnand %p1432_p2, %p1040_p13  ;;  %p1440_p8 = por %p1439_p7, %p1438_p6 }
 0x198   : > { %p1434_p5 = pneg %p1433_p3 }
 0x19a   : > { %p1441_p10 = pnand %p1440_p8, %p1434_p5 }
 0x19c   : > { %1444 = shalt.err (!%p1441_p10)  }
 0x19d   : > { %1023 = dma.hbm_to_vmem [thread:$0]  (%p1040_p13), %s580_s25, 16, %s2096_s0, %s1993_s12 }
 0x19e   : > { %s621_s10 = sadd.s32 %s619_s11, %s2324_s21  ;;  %s624_s22 = sand.u32 127, %s618_s19 }
 0x19f   : > { %s970_s18 = sshll.u32 %s621_s10, 7  ;;  %s860_s29 = scalar_lea.vmem %s1965_s3, 6 [#allocation2] }
 0x1a0   : > { %s968_s5 = sshll.u32 %s2104_s30, 4  ;;  %s625_s23 = sadd.s32 %s970_s18, %s624_s22 }
 0x1a1   : > { %s604_s15 = scalar_lea.hbm %s2245_s1, %s968_s5  ;;  %s642_s27 = sadd.s32 7, %s1963_s14 }
 0x1a2   : > { %s1445_s7 = scalar_lea.hbm %s604_s15, 16  ;;  %p1450_p0 = scmp.lt.s32.totalorder %s604_s15, %s2245_s1 }
 0x1a3   : > { %p1446_p11 = scmp.ne.s32.totalorder %s604_s15, %s1445_s7  ;;  %p1451_p1 = scmp.lt.s32.totalorder %s1755_s26, %s1445_s7 }
 0x1a5   : > { %p1447_p12 = pnand %p1446_p11, %p1040_p13  ;;  %p1452_p2 = por %p1451_p1, %p1450_p0 }
 0x1a7   : > { %p1448_p4 = pneg %p1447_p12 }
 0x1a9   : > { %p1453_p3 = pnand %p1452_p2, %p1448_p4 }
 0x1ab   : > { %1456 = shalt.err (!%p1453_p3)  }
 0x1ac   : > { %s1457_s0 = scalar_lea.vmem %s615_s24, 16  ;;  %p1464_p8 = scmp.lt.s32.totalorder %s615_s24, %s1765_s13 }
 0x1ad   : > { %p1458_p5 = scmp.ne.s32.totalorder %s615_s24, %s1457_s0  ;;  %p1465_p10 = scmp.lt.s32.totalorder %s1768_s17, %s1457_s0 }
 0x1af   : > { %p1459_p6 = pnand %p1458_p5, %p1040_p13  ;;  %p1466_p11 = por %p1465_p10, %p1464_p8 }
 0x1b1   : > { %p1460_p7 = pneg %p1459_p6 }
 0x1b3   : > { %p1467_p12 = pnand %p1466_p11, %p1460_p7 }
 0x1b5   : > { %1470 = shalt.err (!%p1467_p12)  }
 0x1b6   : > { %1026 = dma.hbm_to_vmem [thread:$0]  (%p1040_p13), %s604_s15, 16, %s615_s24, %s1993_s12 }
 0x1b7   : > { %s1027_s16 = scalar_select %p1040_p13, [#allocation5], [#allocation56] }
 0x1b8   : > { %s2338_s23 = smov (!%p1040_p13, %s625_s23), 0  ;;  %s643_s14 = sshra.s32 %s642_s27, 7 }
 0x1b9   : > { %s648_s19 = sand.u32 127, %s642_s27  ;;  %s626_s30 = sld [smem:[%s1027_s16 + %s2338_s23]] }
 0x1ba   : > { %s645_s25 = sadd.s32 %s643_s14, %s2324_s21  ;;  %s638_s11 = sshll.u32 %s860_s29, 4  ;;  %s639_s11 = int_to_ptr.vmem [resolvable:$true] %s638_s11 }
 0x1bb   : > { %s973_s10 = sshll.u32 %s645_s25, 7  ;;  %s865_s18 = scalar_lea.vmem %s1965_s3, 7 [#allocation2] }
 0x1bc   : > { %s649_s22 = sadd.s32 %s973_s10, %s648_s19  ;;  %s662_s7 = sshll.u32 %s865_s18, 4  ;;  %s663_s7 = int_to_ptr.vmem [resolvable:$true] %s662_s7 }
 0x1bd   : > { %s1030_s5 = scalar_select %p1040_p13, [#allocation5], [#allocation57] }
 0x1be   : > { %s2340_s22 = smov (!%p1040_p13, %s649_s22), 0 }
 0x1bf   : > { %s971_s24 = sshll.u32 %s626_s30, 4  ;;  %s650_s9 = sld [smem:[%s1030_s5 + %s2340_s22]] }
 0x1c0   : > { %s628_s27 = scalar_lea.hbm %s2245_s1, %s971_s24 }
 0x1c1   : > { %s1471_s23 = scalar_lea.hbm %s628_s27, 16  ;;  %p1476_p2 = scmp.lt.s32.totalorder %s628_s27, %s2245_s1 }
 0x1c2   : > { %p1472_p4 = scmp.ne.s32.totalorder %s628_s27, %s1471_s23  ;;  %p1477_p3 = scmp.lt.s32.totalorder %s1755_s26, %s1471_s23 }
 0x1c4   : > { %p1473_p0 = pnand %p1472_p4, %p1040_p13  ;;  %p1478_p5 = por %p1477_p3, %p1476_p2 }
 0x1c6   : > { %p1474_p1 = pneg %p1473_p0 }
 0x1c8   : > { %p1479_p6 = pnand %p1478_p5, %p1474_p1 }
 0x1ca   : > { %1482 = shalt.err (!%p1479_p6)  }
 0x1cb   : > { %s1483_s3 = scalar_lea.vmem %s639_s11, 16  ;;  %p1490_p11 = scmp.lt.s32.totalorder %s639_s11, %s1765_s13 }
 0x1cc   : > { %p1484_p7 = scmp.ne.s32.totalorder %s639_s11, %s1483_s3  ;;  %p1491_p12 = scmp.lt.s32.totalorder %s1768_s17, %s1483_s3 }
 0x1ce   : > { %p1485_p8 = pnand %p1484_p7, %p1040_p13  ;;  %p1492_p4 = por %p1491_p12, %p1490_p11 }
 0x1d0   : > { %p1486_p10 = pneg %p1485_p8 }
 0x1d2   : > { %p1493_p0 = pnand %p1492_p4, %p1486_p10 }
 0x1d4   : > { %1496 = shalt.err (!%p1493_p0)  }
 0x1d5   : > { %1029 = dma.hbm_to_vmem [thread:$0]  (%p1040_p13), %s628_s27, 16, %s639_s11, %s1993_s12 }
 0x1d6   : > { %s974_s8 = sshll.u32 %s650_s9, 4 }
 0x1d7   : > { %s652_s14 = scalar_lea.hbm %s2245_s1, %s974_s8 }
 0x1d8   : > { %s1497_s19 = scalar_lea.hbm %s652_s14, 16  ;;  %p1502_p5 = scmp.lt.s32.totalorder %s652_s14, %s2245_s1 }
 0x1d9   : > { %p1498_p1 = scmp.ne.s32.totalorder %s652_s14, %s1497_s19  ;;  %p1503_p6 = scmp.lt.s32.totalorder %s1755_s26, %s1497_s19 }
 0x1db   : > { %p1499_p2 = pnand %p1498_p1, %p1040_p13  ;;  %p1504_p7 = por %p1503_p6, %p1502_p5 }
 0x1dd   : > { %p1500_p3 = pneg %p1499_p2 }
 0x1df   : > { %p1505_p8 = pnand %p1504_p7, %p1500_p3 }
 0x1e1   : > { %1508 = shalt.err (!%p1505_p8)  }
 0x1e2   : > { %s1509_s11 = scalar_lea.vmem %s663_s7, 16  ;;  %p1516_p4 = scmp.lt.s32.totalorder %s663_s7, %s1765_s13 }
 0x1e3   : > { %p1510_p10 = scmp.ne.s32.totalorder %s663_s7, %s1509_s11  ;;  %p1517_p0 = scmp.lt.s32.totalorder %s1768_s17, %s1509_s11 }
 0x1e5   : > { %p1511_p11 = pnand %p1510_p10, %p1040_p13  ;;  %p1518_p1 = por %p1517_p0, %p1516_p4 }
 0x1e7   : > { %p1512_p12 = pneg %p1511_p11 }
 0x1e9   : > { %p1519_p2 = pnand %p1518_p1, %p1512_p12 }
 0x1eb   : > { %1522 = shalt.err (!%p1519_p2)  }
 0x1ec   : > { %1032 = dma.hbm_to_vmem [thread:$0]  (%p1040_p13), %s652_s14, 16, %s663_s7, %s1993_s12  ;;  %v677_v2 = vlaneseq  ;;  %v666_v3 = vld [vmem:[%s2248_s4] sm:$0x3]  ;;  %v675_v13 = vpop.permute.xlu0 %674 }
 0x1ed   : > { %v669_v5 = vrot.slane %v666_v3, 7  ;;  %v687_v10 = vld [vmem:[%s1730_s20] sm:$0xff]  ;;  %s2285_s28 = sld [smem:[#allocation70_spill]]  ;;  %s1608_s0 = smov [#allocation6]  }
 0x1ee   : > { %v678_v4 = vshrl.u32 %v677_v2, 7  ;;  %v688_v11 = vld [vmem:[%s2246_s2] sm:$0xff]  ;;  %s2286_s12 = sld [smem:[#allocation71_spill]]  ;;  %s1527_s16 = sshll.u32 %s1608_s0, 4  ;;  %s1528_s16 = int_to_ptr.vmem [resolvable:$false] %s1527_s16 }
 0x1ef   : > { %v671_v7 = vsub.f32 %v666_v3, %v669_v5  ;;  %v689_v15 = vadd.f32 %v688_v11, %v687_v10  ;;  %s2287_s20 = sld [smem:[#allocation62_spill]]  ;;  %s1529_s14 = scalar_lea.vmem %s1528_s16, 256 }
 0x1f0   : > { %v679_v6 = vsub.s32 1, %v678_v4  ;;  %v684_v8 = vsub.s32 0, %v678_v4  ;;  %s2288_s5 = sld [smem:[#allocation73_spill]] }
 0x1f1   : > { %s2291_s7 = sld [smem:[#allocation74_spill]] }
 0x1f2   : > { %v680_v9 = vrot.slane %v671_v7, %v679_v6  ;;  %v685_v12 = vrot.slane %v666_v3, %v684_v8 }
 0x1f3   : > { %s2290_s9 = scalar_lea.vmem [#allocation6], %s2285_s28 }
 0x1f4   : > { %v681_v14 = vmul.f32 %v680_v9, %v675_v13  ;;  %s731_s6 = sshll.u32 %s2290_s9, 4  ;;  %s2292_s21 = smov %s2290_s9  ;;  %s732_s6 = int_to_ptr.vmem [resolvable:$true] %s731_s6 }
 0x1f5   : > { %s2293_s29 = sand.u32 1, %s2287_s20   ;;  %s1523_s8 = scalar_lea.vmem %s732_s6, 128 }
 0x1f6   : > { %v686_v16 = vadd.f32 %v685_v12, %v681_v14  ;;  %v702_v26 = vld [vmem:[%s2288_s5] sm:$0x3]  ;;  %s717_s3 = scalar_lea.sflag [#allocation7], %s2293_s29  ;;  %p1524_p13 = scmp.ne.s32.totalorder %s732_s6, %s1523_s8 }
 0x1f7   : > { %v707_v27 = vrot.slane %v702_v26, %v684_v8  ;;  %v713_v29 = vrot.slane %v702_v26, %v679_v6  ;;  %s729_s23 = scalar_lea.hbm %s2291_s7, %s2286_s12  ;;  %p1530_p6 = scmp.lt.s32.totalorder %s732_s6, %s1528_s16 }
 0x1f8   : > { %v690_v17 = vadd.f32 %v689_v15, %v686_v16  ;;  %p1525_p3 = pnand %p1524_p13, %p1687_p9  ;;  %p1531_p7 = scmp.lt.s32.totalorder %s1529_s14, %s1523_s8 }
 0x1fa   : > { %691 = vadd.xlane.f32.xlu0 %v690_v17  ;;  %v693_v18 = vmul.f32 %v690_v17, %v690_v17  ;;  %p1526_p5 = pneg %p1525_p3  ;;  %p1532_p8 = por %p1531_p7, %p1530_p6 }
 0x1fc   : > { %694 = vadd.xlane.f32.xlu1 %v693_v18  ;;  %p1533_p10 = pnand %p1532_p8, %p1526_p5 }
 0x283   : > { %v692_v19 = vpop.xlane.xlu0 %691 }
 0x284   : > { %v696_v20 = vmul.f32 0.0078125, %v692_v19 }
 0x285   : > { %v695_v21 = vpop.xlane.xlu1 %694 }
 0x286   : > { %v698_v22 = vmul.f32 %v696_v20, %v696_v20  ;;  %v697_v23 = vmul.f32 0.0078125, %v695_v21  ;;  %v703_v30 = vsub.f32 %v690_v17, %v696_v20 }
 0x288   : > { %v699_v24 = vsub.f32 %v697_v23, %v698_v22 }
 0x28a   : > { %v700_v25 = vadd.f32 1e-12, %v699_v24 }
 0x28c   : > { %1093 = vrsqrt.f32 %v700_v25 }
 0x299   : > { %v1094_v28 = vpop.eup %1093 }
 0x29a   : > { %v708_v31 = vmul.f32 %v1094_v28, %v707_v27 }
 0x29c   : > { %v709_v32 = vmul.f32 %v708_v31, %v703_v30 }
 0x29e   : > { %v714_v33 = vadd.f32 %v713_v29, %v709_v32 }
 0x2a0   : > { %715 = vst [vmem:[%s2292_s21] sm:$0xff] %v714_v33 }
 0x2a1   : > { %1536 = shalt.err (!%p1533_p10)
}
 0x2a2   : > { %s1537_s19 = scalar_lea.hbm %s729_s23, 128  ;;  %s1541_s11 = scalar_lea.hbm %s2291_s7, 256 }
 0x2a3   : > { %p1538_p11 = scmp.ne.s32.totalorder %s729_s23, %s1537_s19  ;;  %p1542_p0 = scmp.lt.s32.totalorder %s729_s23, %s2291_s7 }
 0x2a4   : > { %p1543_p1 = scmp.lt.s32.totalorder %s1541_s11, %s1537_s19 }
 0x2a5   : > { %p1539_p12 = pnand %p1538_p11, %p1687_p9 }
 0x2a6   : > { %p1544_p2 = por %p1543_p1, %p1542_p0 }
 0x2a7   : > { %p1540_p4 = pneg %p1539_p12 }
 0x2a9   : > { %p1545_p13 = pnand %p1544_p2, %p1540_p4 }
 0x2ab   : > { %1548 = shalt.err (!%p1545_p13)
}
 0x2ac   : > { %1033 = dma.vmem_to_hbm [thread:$0]  (%p1687_p9), %s732_s6, 128, %s729_s23, %s717_s3  }
 0x2ad PF: > { %s2294_s13 = sld [smem:[#allocation65_spill]] }
 0x2ae   : > { %s2295_s17 = sld [smem:[#allocation61_spill]] }
 0x2af   : > { %s2296_s28 = sld [smem:[#allocation68_spill]] }
 0x2b3   : > { %p1041_p3 = scmp.ge.s32.totalorder %s2294_s13, 2 }
 0x2b4   : > { %s743_s12 = sand.u32 1, %s2295_s17  }
 0x2b5   : > { %p2297_p5 = scmp.ne.s32.totalorder %s2296_s28, 0  ;;  %s744_s20 = scalar_lea.sflag [#allocation7], %s743_s12 }
 0x2b7   : > { %p1036_p6 = pnand %p1041_p3, %p2297_p5 }
 0x2b9   : > { %p1037_p7 = pneg %p1036_p6 }
 0x2bb   : > { %1578 = dma.done.wait (%p1037_p7), %s744_s20, 128  }
 0x2bc   : > { %1580 = vsyncadd (%p1037_p7), %s744_s20, 4294967168  ;;  %s25_s30 = sadd.s32 1, %s2294_s13   ;;  %s2298_s26 = sld [smem:[#allocation62_spill]] }
 0x2bd   : > { %p22_p8 = scmp.ge.s32.totalorder %s25_s30, 4   ;;  %s2299_s27 = sld [smem:[#allocation63_spill]] }
 0x2be   : > { %s2300_s0 = sld [smem:[#allocation69_spill]] }
 0x2bf   : > { %s2301_s28 = sld [smem:[#allocation64_spill]]  ;;  %24 = sbr.rel (!%p22_p8) target bundleno = 20 (0x14), region = 183 }
 0x2c0   : > { %s2302_s29 = sld [smem:[#allocation66_spill]] }
 0x2c4   :  { %749 = vsyncpa [#allocation7], 1 }
 0x2c5   :  { %751 = vsyncpa [#allocation7 + $0x1], 1 }
 0x2c6   :  { %752 = vsyncmov [#allocation3] }
 0x2c9   :  { %s753_s22 = vpop.sfrf %752 }
 0x2ca   :  { %p980_p9 = scmp.ne.s32.totalorder %s753_s22, 0 }
 0x2cc   :  { %757 = shalt.err (%p980_p9)  }
 0x2cd   :  { %759 = vsyncmov [#allocation3 + $0x1] }
 0x2d0   :  { %s760_s18 = vpop.sfrf %759 }
 0x2d1   :  { %p981_p10 = scmp.ne.s32.totalorder %s760_s18, 0 }
 0x2d3   :  { %764 = shalt.err (%p981_p10)  }

</bundles_post_ra>
